<compile_context>
chip_gen: v5e
topology: v5e:2x2
jax: 0.10.0
libtpu: 0.0.40
codegen_flags: <defaults>
</compile_context>

<pallas_src>
import jax
import jax.numpy as jnp
from jax.experimental import pallas as pl
from jax.experimental.pallas import tpu as pltpu


# Fixed classifier dims from the PyTorch module.
D_EMB = 512   # facenet embedding size
D_H1 = 256    # classifier Linear(512, 256)
D_H2 = 128    # classifier Linear(256, 128)

_LANE = 128
_SUBLANE_BF16 = 16   # bf16 packs 16 sublanes per vreg


def _round_up(n, m):
    return ((n + m - 1) // m) * m


def _make_kernel(n_out_pad):
    # Static bias-slice offsets inside the consolidated bias tensor.
    # All offsets are multiples of 128 lanes, so slices stay vreg-aligned.
    o1 = D_EMB                    # 512
    o2 = D_EMB + D_H1             # 768
    o3 = D_EMB + D_H1 + D_H2      # 896

    def kernel(x_ref, we_ref, w1_ref, w2_ref, w3_ref, bias_ref,
               out_ref, acc_ref):
        # x_ref:   (tm, tk)       bf16   (K-tile of the flattened image)
        # we_ref:  (tk, 512)      bf16   (K-tile of the embedding weight)
        # w1_ref:  (512, 256)     bf16   (resident across K)
        # w2_ref:  (256, 128)     bf16   (resident across K)
        # w3_ref:  (128, Np)      bf16   (zero-padded beyond num_emotions)
        # bias_ref:(1, 896+Np)    f32    (be | b1 | b2 | b3_padded)
        # out_ref: (tm, Np)       f32    (written only in the epilogue)
        # acc_ref: (tm, 512)      f32    VMEM accumulator for the embedding.
        k = pl.program_id(1)

        @pl.when(k == 0)
        def _():
            acc_ref[...] = jnp.zeros_like(acc_ref)

        # Partial embedding matmul for this K-tile (bf16 -> f32 accumulate).
        acc_ref[...] += jnp.dot(x_ref[...], we_ref[...],
                                preferred_element_type=jnp.float32)

        @pl.when(k == pl.num_programs(1) - 1)
        def _():
            be = bias_ref[:, :o1]                 # (1, 512)
            b1 = bias_ref[:, o1:o2]               # (1, 256)
            b2 = bias_ref[:, o2:o3]               # (1, 128)
            b3 = bias_ref[:, o3:o3 + n_out_pad]   # (1, Np)

            # ---- synthetic "facenet" embedding: bias + L2-normalize --------
            emb = acc_ref[...] + be
            inv_norm = jax.lax.rsqrt(
                jnp.sum(emb * emb, axis=-1, keepdims=True) + 1e-10)
            emb = emb * inv_norm                  # (tm, 512) unit-norm rows

            # ---- classifier MLP (eval mode: Dropout == identity) -----------
            h1 = jnp.dot(emb.astype(jnp.bfloat16), w1_ref[...],
                         preferred_element_type=jnp.float32) + b1
            h1 = jnp.maximum(h1, 0.0)             # ReLU
            h2 = jnp.dot(h1.astype(jnp.bfloat16), w2_ref[...],
                         preferred_element_type=jnp.float32) + b2
            h2 = jnp.maximum(h2, 0.0)             # ReLU
            out = jnp.dot(h2.astype(jnp.bfloat16), w3_ref[...],
                          preferred_element_type=jnp.float32) + b3

            out_ref[...] = out                    # full-lane, unmasked store

    return kernel


def prepare_params(params, in_features, num_emotions=8, tk=2048):
    """One-time preprocessing of the FROZEN weights (cast/pad/concat once)."""
    we, be, w1, b1, w2, b2, w3, b3 = params
    F = in_features

    # K-tile size: multiple of 128 lanes, capped by the (lane-rounded) F.
    tk = min(_round_up(tk, _LANE), _round_up(F, _LANE))
    Fp = _round_up(F, tk)                       # feature dim padded to tk
    Np = _round_up(num_emotions, _LANE)         # lane-dense logits (128)

    we_p = jnp.zeros((Fp, D_EMB), jnp.bfloat16).at[:F, :].set(
        we.astype(jnp.bfloat16))
    w1_b = w1.astype(jnp.bfloat16)
    w2_b = w2.astype(jnp.bfloat16)
    # Zero-padded extra logit columns so nothing leaks (caller slices anyway).
    w3_p = jnp.zeros((D_H2, Np), jnp.bfloat16).at[:, :num_emotions].set(
        w3.astype(jnp.bfloat16))
    b3_p = jnp.zeros((1, Np), jnp.float32).at[:, :num_emotions].set(
        b3.astype(jnp.float32))

    # Consolidate all biases into ONE f32 tensor: one DMA stream, 4 slices.
    bias_all = jnp.concatenate(
        [be.astype(jnp.float32), b1.astype(jnp.float32),
         b2.astype(jnp.float32), b3_p], axis=-1)   # (1, 896 + Np)

    return dict(we=we_p, w1=w1_b, w2=w2_b, w3=w3_p, bias=bias_all,
                F=F, Fp=Fp, Np=Np, tk=tk, num_emotions=num_emotions)


def facenet_classifier_forward(x_nchw, prep):
    """x_nchw: (B, C, H, W) float32. Returns (B, num_emotions) f32 logits."""
    B = x_nchw.shape[0]
    x_flat = x_nchw.reshape(B, -1)
    F, Fp, Np, tk = prep["F"], prep["Fp"], prep["Np"], prep["tk"]
    assert x_flat.shape[1] == F, (x_flat.shape, F)

    # Batch padded to a full bf16 sublane group (16 rows / packed vreg).
    Bp = max(_SUBLANE_BF16, _round_up(B, _SUBLANE_BF16))

    # Single cast + pad materialization of the input (one extra copy, not two).
    x_p = jnp.pad(x_flat.astype(jnp.bfloat16), ((0, Bp - B), (0, Fp - F)))

    tm = Bp                         # one M tile at small batch
    grid = (Bp // tm, Fp // tk)     # (M parallel, K reduction last)
    n_bias = prep["bias"].shape[1]

    flops = 2 * Bp * (Fp * D_EMB + D_EMB * D_H1 + D_H1 * D_H2 + D_H2 * Np)
    bytes_accessed = (
        x_p.size * 2 + prep["we"].size * 2 + prep["w1"].size * 2
        + prep["w2"].size * 2 + prep["w3"].size * 2
        + prep["bias"].size * 4 + Bp * Np * 4)

    # Explicit VMEM budget: double-buffered x/we tiles + resident classifier
    # weights/biases + f32 accumulator + output, with headroom.
    vmem_bytes = (2 * tm * tk * 2 + 2 * tk * D_EMB * 2
                  + (D_EMB * D_H1 + D_H1 * D_H2 + D_H2 * Np) * 2
                  + n_bias * 4 + tm * D_EMB * 4 + 2 * tm * Np * 4)
    vmem_limit = int(min(64 << 20, max(32 << 20, 2 * vmem_bytes)))

    out_full = pl.pallas_call(
        _make_kernel(Np),
        out_shape=jax.ShapeDtypeStruct((Bp, Np), jnp.float32),
        grid_spec=pltpu.PrefetchScalarGridSpec(
            num_scalar_prefetch=0,
            grid=grid,
            in_specs=[
                pl.BlockSpec((tm, tk), lambda m, k: (m, k)),        # x
                pl.BlockSpec((tk, D_EMB), lambda m, k: (k, 0)),     # we (streamed over K)
                pl.BlockSpec((D_EMB, D_H1), lambda m, k: (0, 0)),   # w1 (resident)
                pl.BlockSpec((D_H1, D_H2), lambda m, k: (0, 0)),    # w2 (resident)
                pl.BlockSpec((D_H2, Np), lambda m, k: (0, 0)),      # w3 (resident)
                pl.BlockSpec((1, n_bias), lambda m, k: (0, 0)),     # biases
            ],
            out_specs=pl.BlockSpec((tm, Np), lambda m, k: (m, 0)),  # k-constant
            scratch_shapes=[pltpu.VMEM((tm, D_EMB), jnp.float32)],
        ),
        compiler_params=pltpu.CompilerParams(
            dimension_semantics=("parallel", "arbitrary"),
            vmem_limit_bytes=vmem_limit),
        cost_estimate=pl.CostEstimate(
            flops=flops, transcendentals=Bp, bytes_accessed=bytes_accessed),
    )(x_p, prep["we"], prep["w1"], prep["w2"], prep["w3"], prep["bias"])

    return out_full[:B, :prep["num_emotions"]]


def init_params(key, in_features, num_emotions=8):
    """Deterministic synthetic parameters (shapes from the module __init__)."""
    ks = jax.random.split(key, 8)

    def lin(kw, kb, fan_in, fan_out):
        # Kaiming-uniform-ish deterministic init, pre-transposed to (in, out).
        bound = 1.0 / jnp.sqrt(jnp.float32(fan_in))
        w = jax.random.uniform(kw, (fan_in, fan_out), jnp.float32, -bound, bound)
        b = jax.random.uniform(kb, (1, fan_out), jnp.float32, -bound, bound)
        return w, b

    we, be = lin(ks[0], ks[1], in_features, D_EMB)      # synthetic facenet head
    w1, b1 = lin(ks[2], ks[3], D_EMB, D_H1)             # classifier[0]
    w2, b2 = lin(ks[4], ks[5], D_H1, D_H2)              # classifier[3]
    w3, b3 = lin(ks[6], ks[7], D_H2, num_emotions)      # classifier[6]
    return (we, be, w1, b1, w2, b2, w3, b3)


def reference_forward(x_nchw, params):
    """Plain-JAX reference with the SAME bf16/f32 precision chain."""
    we, be, w1, b1, w2, b2, w3, b3 = params
    x = x_nchw.reshape(x_nchw.shape[0], -1).astype(jnp.bfloat16)
    emb = jnp.dot(x, we.astype(jnp.bfloat16),
                  preferred_element_type=jnp.float32) + be
    emb = emb * jax.lax.rsqrt(jnp.sum(emb * emb, -1, keepdims=True) + 1e-10)
    h1 = jnp.maximum(jnp.dot(emb.astype(jnp.bfloat16), w1.astype(jnp.bfloat16),
                             preferred_element_type=jnp.float32) + b1, 0.0)
    h2 = jnp.maximum(jnp.dot(h1.astype(jnp.bfloat16), w2.astype(jnp.bfloat16),
                             preferred_element_type=jnp.float32) + b2, 0.0)
    return jnp.dot(h2.astype(jnp.bfloat16), w3.astype(jnp.bfloat16),
                   preferred_element_type=jnp.float32) + b3


if __name__ == "__main__":
    key = jax.random.PRNGKey(0)
    k_x, k_p = jax.random.split(key)

    # Small RGB image batch consistent with a face-image input: (B, C, H, W).
    B, C, H, W = 2, 3, 16, 16
    NUM_EMOTIONS = 8
    x = jax.random.normal(k_x, (B, C, H, W), dtype=jnp.float32)

    params = init_params(k_p, in_features=C * H * W, num_emotions=NUM_EMOTIONS)

    # One-time weight preprocessing (frozen weights). tk=256 here to exercise
    # the multi-step K reduction grid even at this toy feature size (F=768
    # -> 3 K-tiles); at real facenet sizes use the default tk=2048.
    prep = prepare_params(params, in_features=C * H * W,
                          num_emotions=NUM_EMOTIONS, tk=256)

    out = facenet_classifier_forward(x, prep)
    out = jax.block_until_ready(out)

    ref = reference_forward(x, params)
    assert out.shape == (B, NUM_EMOTIONS), out.shape
    assert bool(jnp.all(jnp.isfinite(out)))
    # bf16 MXU inputs with f32 accumulation: allow bf16-level tolerance.
    assert jnp.allclose(out, ref, atol=2e-2, rtol=2e-2), (
        float(jnp.max(jnp.abs(out - ref)))
    )

    print("KERNEL_OK")
</pallas_src>

<mosaic_0001>
module attributes {stable_mosaic.version = 11 : i64} {
  func.func @kernel(%arg0: i32, %arg1: i32, %arg2: memref<16x256xbf16, #tpu.memory_space<vmem>>, %arg3: memref<256x512xbf16, #tpu.memory_space<vmem>>, %arg4: memref<512x256xbf16, #tpu.memory_space<vmem>>, %arg5: memref<256x128xbf16, #tpu.memory_space<vmem>>, %arg6: memref<128x128xbf16, #tpu.memory_space<vmem>>, %arg7: memref<1x1024xf32, #tpu.memory_space<vmem>>, %arg8: memref<16x128xf32, #tpu.memory_space<vmem>>, %arg9: memref<16x512xf32, #tpu.memory_space<vmem>>) attributes {dimension_semantics = [#tpu.dimension_semantics<parallel>, #tpu.dimension_semantics<arbitrary>], iteration_bounds = array<i64: 1, 3>, scalar_prefetch = 0 : i64, scratch_operands = 1 : i64, tpu.core_type = #tpu.core_type<tc>, window_params = [{transform_indices = @transform_0, window_bounds = array<i64: 16, 256>}, {transform_indices = @transform_1, window_bounds = array<i64: 256, 512>}, {pipeline_mode = #tpu.pipeline_mode<synchronous>, transform_indices = @transform_2, window_bounds = array<i64: 512, 256>}, {pipeline_mode = #tpu.pipeline_mode<synchronous>, transform_indices = @transform_3, window_bounds = array<i64: 256, 128>}, {pipeline_mode = #tpu.pipeline_mode<synchronous>, transform_indices = @transform_4, window_bounds = array<i64: 128, 128>}, {pipeline_mode = #tpu.pipeline_mode<synchronous>, transform_indices = @transform_5, window_bounds = array<i64: 1, 1024>}, {transform_indices = @transform_6, window_bounds = array<i64: 16, 128>}]} {
    %c0_i32 = arith.constant 0 : i32
    %0 = arith.cmpi eq, %arg1, %c0_i32 : i32
    %1 = arith.extui %0 : i1 to i32
    %c0_i32_0 = arith.constant 0 : i32
    %2 = arith.cmpi ne, %1, %c0_i32_0 : i32
    scf.if %2 {
      %cst_9 = arith.constant 0.000000e+00 : f32
      %12 = vector.broadcast %cst_9 : f32 to vector<16x512xf32>
      %c0_10 = arith.constant 0 : index
      %c0_11 = arith.constant 0 : index
      %13 = vector.load %arg9[%c0_10, %c0_11] : memref<16x512xf32, #tpu.memory_space<vmem>>, vector<16x512xf32>
      tpu.vector_store %arg9[%c0_10, %c0_11], %12 {strides = array<i32>} : memref<16x512xf32, #tpu.memory_space<vmem>>, vector<16x512xf32>,
    } else {
    }
    %c0 = arith.constant 0 : index
    %c0_1 = arith.constant 0 : index
    %3 = vector.load %arg9[%c0, %c0_1] : memref<16x512xf32, #tpu.memory_space<vmem>>, vector<16x512xf32>
    %c0_2 = arith.constant 0 : index
    %c0_3 = arith.constant 0 : index
    %4 = vector.load %arg2[%c0_2, %c0_3] : memref<16x256xbf16, #tpu.memory_space<vmem>>, vector<16x256xbf16>
    %c0_4 = arith.constant 0 : index
    %c0_5 = arith.constant 0 : index
    %5 = vector.load %arg3[%c0_4, %c0_5] : memref<256x512xbf16, #tpu.memory_space<vmem>>, vector<256x512xbf16>
    %cst = arith.constant dense<0.000000e+00> : vector<16x512xf32>
    %6 = tpu.matmul %4, %5, %cst {dimension_numbers = #tpu.dot_dimension_numbers<[1], [0], [0], [1], [0, 0, 1, 1], [], []>} : vector<16x256xbf16>, vector<256x512xbf16>, vector<16x512xf32> -> vector<16x512xf32>
    %7 = arith.addf %3, %6 : vector<16x512xf32>
    %c0_6 = arith.constant 0 : index
    %c0_7 = arith.constant 0 : index
    %8 = vector.load %arg9[%c0_6, %c0_7] : memref<16x512xf32, #tpu.memory_space<vmem>>, vector<16x512xf32>
    tpu.vector_store %arg9[%c0_6, %c0_7], %7 {strides = array<i32>} : memref<16x512xf32, #tpu.memory_space<vmem>>, vector<16x512xf32>,
    %c2_i32 = arith.constant 2 : i32
    %9 = arith.cmpi eq, %arg1, %c2_i32 : i32
    %10 = arith.extui %9 : i1 to i32
    %c0_i32_8 = arith.constant 0 : i32
    %11 = arith.cmpi ne, %10, %c0_i32_8 : i32
    scf.if %11 {
      %c0_9 = arith.constant 0 : index
      %c0_10 = arith.constant 0 : index
      %12 = vector.load %arg7[%c0_9, %c0_10] : memref<1x1024xf32, #tpu.memory_space<vmem>>, vector<1x512xf32>
      %c0_11 = arith.constant 0 : index
      %c512 = arith.constant 512 : index
      %13 = vector.load %arg7[%c0_11, %c512] : memref<1x1024xf32, #tpu.memory_space<vmem>>, vector<1x256xf32>
      %c0_12 = arith.constant 0 : index
      %c768 = arith.constant 768 : index
      %14 = vector.load %arg7[%c0_12, %c768] : memref<1x1024xf32, #tpu.memory_space<vmem>>, vector<1x128xf32>
      %c0_13 = arith.constant 0 : index
      %c896 = arith.constant 896 : index
      %15 = vector.load %arg7[%c0_13, %c896] : memref<1x1024xf32, #tpu.memory_space<vmem>>, vector<1x128xf32>
      %c0_14 = arith.constant 0 : index
      %c0_15 = arith.constant 0 : index
      %16 = vector.load %arg9[%c0_14, %c0_15] : memref<16x512xf32, #tpu.memory_space<vmem>>, vector<16x512xf32>
      %17 = vector.broadcast %12 : vector<1x512xf32> to vector<16x512xf32>
      %18 = arith.addf %16, %17 : vector<16x512xf32>
      %19 = arith.mulf %18, %18 : vector<16x512xf32>
      %cst_16 = arith.constant dense<0.000000e+00> : vector<16xf32>
      %20 = vector.multi_reduction <add>, %19, %cst_16 [1] : vector<16x512xf32> to vector<16xf32>
      %21 = vector.shape_cast %20 : vector<16xf32> to vector<16x1xf32>
      %cst_17 = arith.constant 1.000000e-10 : f32
      %22 = vector.broadcast %cst_17 : f32 to vector<16x1xf32>
      %23 = arith.addf %21, %22 : vector<16x1xf32>
      %24 = math.rsqrt %23 : vector<16x1xf32>
      %25 = vector.broadcast %24 : vector<16x1xf32> to vector<16x512xf32>
      %26 = arith.mulf %18, %25 : vector<16x512xf32>
      %27 = arith.truncf %26 : vector<16x512xf32> to vector<16x512xbf16>
      %c0_18 = arith.constant 0 : index
      %c0_19 = arith.constant 0 : index
      %28 = vector.load %arg4[%c0_18, %c0_19] : memref<512x256xbf16, #tpu.memory_space<vmem>>, vector<512x256xbf16>
      %cst_20 = arith.constant dense<0.000000e+00> : vector<16x256xf32>
      %29 = tpu.matmul %27, %28, %cst_20 {dimension_numbers = #tpu.dot_dimension_numbers<[1], [0], [0], [1], [0, 0, 1, 1], [], []>} : vector<16x512xbf16>, vector<512x256xbf16>, vector<16x256xf32> -> vector<16x256xf32>
      %30 = vector.broadcast %13 : vector<1x256xf32> to vector<16x256xf32>
      %31 = arith.addf %29, %30 : vector<16x256xf32>
      %cst_21 = arith.constant 0.000000e+00 : f32
      %32 = vector.broadcast %cst_21 : f32 to vector<16x256xf32>
      %33 = arith.maximumf %31, %32 : vector<16x256xf32>
      %34 = arith.truncf %33 : vector<16x256xf32> to vector<16x256xbf16>
      %c0_22 = arith.constant 0 : index
      %c0_23 = arith.constant 0 : index
      %35 = vector.load %arg5[%c0_22, %c0_23] : memref<256x128xbf16, #tpu.memory_space<vmem>>, vector<256x128xbf16>
      %cst_24 = arith.constant dense<0.000000e+00> : vector<16x128xf32>
      %36 = tpu.matmul %34, %35, %cst_24 {dimension_numbers = #tpu.dot_dimension_numbers<[1], [0], [0], [1], [0, 0, 1, 1], [], []>} : vector<16x256xbf16>, vector<256x128xbf16>, vector<16x128xf32> -> vector<16x128xf32>
      %37 = vector.broadcast %14 : vector<1x128xf32> to vector<16x128xf32>
      %38 = arith.addf %36, %37 : vector<16x128xf32>
      %cst_25 = arith.constant 0.000000e+00 : f32
      %39 = vector.broadcast %cst_25 : f32 to vector<16x128xf32>
      %40 = arith.maximumf %38, %39 : vector<16x128xf32>
      %41 = arith.truncf %40 : vector<16x128xf32> to vector<16x128xbf16>
      %c0_26 = arith.constant 0 : index
      %c0_27 = arith.constant 0 : index
      %42 = vector.load %arg6[%c0_26, %c0_27] : memref<128x128xbf16, #tpu.memory_space<vmem>>, vector<128x128xbf16>
      %cst_28 = arith.constant dense<0.000000e+00> : vector<16x128xf32>
      %43 = tpu.matmul %41, %42, %cst_28 {dimension_numbers = #tpu.dot_dimension_numbers<[1], [0], [0], [1], [0, 0, 1, 1], [], []>} : vector<16x128xbf16>, vector<128x128xbf16>, vector<16x128xf32> -> vector<16x128xf32>
      %44 = vector.broadcast %15 : vector<1x128xf32> to vector<16x128xf32>
      %45 = arith.addf %43, %44 : vector<16x128xf32>
      %c0_29 = arith.constant 0 : index
      %c0_30 = arith.constant 0 : index
      %46 = vector.load %arg8[%c0_29, %c0_30] : memref<16x128xf32, #tpu.memory_space<vmem>>, vector<16x128xf32>
      tpu.vector_store %arg8[%c0_29, %c0_30], %45 {strides = array<i32>} : memref<16x128xf32, #tpu.memory_space<vmem>>, vector<16x128xf32>,
    } else {
    }
    return
  }
  func.func @transform_0(%arg0: i32, %arg1: i32) -> (i32, i32) {
    %c0_i32 = arith.constant 0 : i32
    return %arg0, %arg1 : i32, i32
  }
  func.func @transform_1(%arg0: i32, %arg1: i32) -> (i32, i32) {
    %c0_i32 = arith.constant 0 : i32
    %c0_i32_0 = arith.constant 0 : i32
    return %arg1, %c0_i32 : i32, i32
  }
  func.func @transform_2(%arg0: i32, %arg1: i32) -> (i32, i32) {
    %c0_i32 = arith.constant 0 : i32
    %c0_i32_0 = arith.constant 0 : i32
    %c0_i32_1 = arith.constant 0 : i32
    return %c0_i32, %c0_i32_0 : i32, i32
  }
  func.func @transform_3(%arg0: i32, %arg1: i32) -> (i32, i32) {
    %c0_i32 = arith.constant 0 : i32
    %c0_i32_0 = arith.constant 0 : i32
    %c0_i32_1 = arith.constant 0 : i32
    return %c0_i32, %c0_i32_0 : i32, i32
  }
  func.func @transform_4(%arg0: i32, %arg1: i32) -> (i32, i32) {
    %c0_i32 = arith.constant 0 : i32
    %c0_i32_0 = arith.constant 0 : i32
    %c0_i32_1 = arith.constant 0 : i32
    return %c0_i32, %c0_i32_0 : i32, i32
  }
  func.func @transform_5(%arg0: i32, %arg1: i32) -> (i32, i32) {
    %c0_i32 = arith.constant 0 : i32
    %c0_i32_0 = arith.constant 0 : i32
    %c0_i32_1 = arith.constant 0 : i32
    return %c0_i32, %c0_i32_0 : i32, i32
  }
  func.func @transform_6(%arg0: i32, %arg1: i32) -> (i32, i32) {
    %c0_i32 = arith.constant 0 : i32
    %c0_i32_0 = arith.constant 0 : i32
    return %arg0, %c0_i32 : i32, i32
  }
}

</mosaic_0001>

<bundles_post_ra>
// kernel: tpu_custom_call.1
= control target key start
LH: loop header
LB: loop body
LE: loop exit
PB: predicated region body
PF: predicated region fallthrough
CT: control target
= control target key end

     0   :  { %s3525_s0 = inlined_call_operand.hbm [shape: bf16[16,768], index: 0, kind: input, shape index: {}]   ;;  %s3526_s1 = inlined_call_operand.hbm [shape: bf16[768,512], index: 1, kind: input, shape index: {}]   ;;  %s3527_s2 = inlined_call_operand.hbm [shape: bf16[512,256], index: 2, kind: input, shape index: {}]   ;;  %s3528_s3 = inlined_call_operand.hbm [shape: bf16[256,128], index: 3, kind: input, shape index: {}]   ;;  %s3529_s4 = inlined_call_operand.hbm [shape: bf16[128,128], index: 4, kind: input, shape index: {}]   ;;  %s3530_s5 = inlined_call_operand.hbm [shape: f32[1,1024], index: 5, kind: input, shape index: {}]   ;;  %s3531_s6 = inlined_call_operand.hbm [shape: f32[16,128], index: 6, kind: output, shape index: {}]  }
   0x1   :  { %3535 = sst [smem:[#allocation22_spill]] %s3525_s0 }
   0x2   :  { %3536 = sst [smem:[#allocation23_spill]] %s3527_s2 }
   0x3   :  { %3537 = sst [smem:[#allocation24_spill]] %s3528_s3 }
   0x4   :  { %3538 = sst [smem:[#allocation25_spill]] %s3529_s4 }
   0x5   :  { %3539 = sst [smem:[#allocation26_spill]] %s3530_s5 }
   0x6   :  { %11 = vsyncpa [#allocation4], 0 }
   0x7   :  { %13 = vsyncpa [#allocation4 + $0x1], 0 }
   0x8   :  { %14 = vsyncpa [#allocation7], 0 }
   0x9   :  { %16 = vsyncpa [#allocation7 + $0x1], 0 }
   0xa   :  { %17 = vsyncpa [#allocation10], 0 }
   0xb   :  { %18 = vsyncpa [#allocation13], 0 }
   0xc   :  { %19 = vsyncpa [#allocation5], 0  ;;  %s3167_s21 = smov 0   ;;  %s3169_s22 = smov 0  }
   0xd   :  { %s3171_s23 = smov 0   ;;  %s3173_s24 = smov 0  }
   0xe   :  { %s3175_s25 = smov 0   ;;  %s3177_s26 = smov 0  }
   0xf LB: > { %s3196_s27 = sadd.s32 4294967295, %s3115_s26   ;;  %p59_p0 = scmp.ne.s32.totalorder %s3099_s22, %s3095_s21  ;;  %s3115_s26 = sphi %s3177_s26, %s25_s26   ;;  %s3111_s25 = sphi %s3175_s25, %s3558_s25   ;;  %s3107_s24 = sphi %s3173_s24, %s3557_s24   ;;  %s3103_s23 = sphi %s3171_s23, %s3556_s23   ;;  %s3099_s22 = sphi %s3169_s22, %s3555_s22   ;;  %s3095_s21 = sphi %s3167_s21, %s3554_s21  }
  0x10   : > { %p60_p1 = scmp.eq.s32.totalorder %s3196_s27, 0  ;;  %p1914_p2 = scmp.ge.s32.totalorder %s3115_s26, 1 }
  0x11   : > { %p206_p3 = scmp.lt.s32.totalorder %s3115_s26, 4  ;;  %s3541_s2 = sld [smem:[#allocation23_spill]] }
  0x12   : > { %p3204_p4 = por %p60_p1, %p59_p0  ;;  %s3117_s9 = smov [#allocation8]  }
  0x13   : > { %p3211_p5 = pnand %p1914_p2, %p206_p3  ;;  %s219_s10 = sshll.u32 %s3117_s9, 4  ;;  %s220_s10 = int_to_ptr.vmem [resolvable:$true] %s219_s10 }
  0x14   : > { %s3544_s3 = sld [smem:[#allocation24_spill]]  ;;  %s3532_s15 = smov 128  }
  0x15   : > { %p2737_p6 = pneg %p3211_p5  ;;  %s3533_s16 = smov 8  }
  0x16   : > { %s3120_s17 = smov [#allocation9]   ;;  %s3121_s19 = smov 64  }
  0x17   : > { %s217_s7 = sshll.u32 %s3541_s2, 4  ;;  %p3219_p7 = pnand %p2737_p6, %p60_p1  ;;  %s218_s7 = int_to_ptr.hbm [resolvable:$true] %s217_s7 }
  0x18   : > { %s233_s18 = sshll.u32 %s3120_s17, 4  ;;  %s3122_s20 = smov 4   ;;  %s234_s18 = int_to_ptr.vmem [resolvable:$true] %s233_s18 }
  0x19   : > { %2740 = dma.hbm_to_vmem [thread:$0]  (!%p3219_p7), %s218_s7, 8192, %s220_s10, [#allocation7], %s3532_s15, %s3532_s15, %s3533_s16  }
  0x1a   : > { %s231_s14 = sshll.u32 %s3544_s3, 4  ;;  %s3545_s4 = sld [smem:[#allocation25_spill]]  ;;  %s232_s14 = int_to_ptr.hbm [resolvable:$true] %s231_s14 }
  0x1b   : > { %2743 = dma.hbm_to_vmem [thread:$0]  (!%p3219_p7), %s232_s14, 2048, %s234_s18, [#allocation10], %s3121_s19, %s3121_s19, %s3122_s20  }
  0x1c   : > { %s3123_s7 = smov [#allocation11]   ;;  %s3546_s5 = sld [smem:[#allocation26_spill]] }
  0x1d   : > { %s247_s9 = sshll.u32 %s3123_s7, 4  ;;  %s3124_s14 = smov [#allocation12]   ;;  %s248_s9 = int_to_ptr.vmem [resolvable:$true] %s247_s9 }
  0x1e   : > { %s262_s17 = sshll.u32 %s3124_s14, 4  ;;  %s34_s18 = sadd.s32 1, %s3111_s25  ;;  %s263_s17 = int_to_ptr.vmem [resolvable:$true] %s262_s17 }
  0x1f   : > { %s46_s21 = sadd.s32 1, %s3103_s23  ;;  %p35_p8 = scmp.ge.s32.totalorder %s34_s18, 3 }
  0x20   : > { %s245_s30 = sshll.u32 %s3545_s4, 4  ;;  %p53_p9 = scmp.ne.s32.totalorder %s3103_s23, %s3099_s22  ;;  %s246_s30 = int_to_ptr.hbm [resolvable:$true] %s245_s30 }
  0x21   : > { %2746 = dma.hbm_to_vmem [thread:$0]  (!%p3219_p7), %s246_s30, 1024, %s248_s9, [#allocation10], %s3121_s19, %s3121_s19, %s3122_s20  }
  0x22   : > { %s260_s13 = sshll.u32 %s3546_s5, 4  ;;  %p54_p10 = scmp.eq.s32.totalorder %s3115_s26, 0  ;;  %s261_s13 = int_to_ptr.hbm [resolvable:$true] %s260_s13 }
  0x23   : > { %2749 = dma.hbm_to_vmem [thread:$0]  (!%p3219_p7), %s261_s13, 128, %s263_s17, [#allocation13]  }
  0x24   : > { %p2761_p11 = scmp.lt.s32.totalorder %s3115_s26, 3  ;;  %s3560_s18 = smov (%p35_p8, %s34_s18), 0 }
  0x25   : > { %3547 = sst [smem:[#allocation21_spill]] %s3560_s18  ;;  %p3251_p12 = por %p54_p10, %p53_p9 }
  0x26   : > { %s273_s20 = sand.u32 1, %s3103_s23   ;;  %s42_s29 = ssub.s32 %s3111_s25, %s3560_s18 }
  0x27   : > { %p44_p13 = scmp.eq.s32.totalorder %s42_s29, 0  ;;  %s1920_s11 = sshll.u32 %s273_s20, 4 }
  0x28   : > { %s2556_s30 = sshll.u32 %s3111_s25, 3  ;;  %s3549_s0 = sld [smem:[#allocation22_spill]] }
  0x29   : > { %s3260_s7 = scalar_select %p44_p13, %s3103_s23, %s46_s21  }
  0x2a   : > { %s277_s13 = scalar_lea.vmem [#allocation3], %s1920_s11  ;;  %p3269_p0 = pnand %p2761_p11, %p3251_p12 }
  0x2b   : > { %s288_s14 = sshll.u32 %s277_s13, 4  ;;  %s298_s29 = sand.u32 1, %s3115_s26   ;;  %s289_s14 = int_to_ptr.vmem [resolvable:$true] %s288_s14 }
  0x2c   : > { %s274_s21 = scalar_lea.sflag [#allocation4], %s273_s20  ;;  %s3125_s16 = smov 384  }
  0x2d   : > { %s3551_s2 = smov 8   ;;  %s3552_s9 = smov 128  }
  0x2e   : > { %s285_s12 = scalar_lea.hbm %s3549_s0, %s2556_s30  ;;  %s1923_s11 = sshll.u32 %s273_s20, 9 }
  0x2f   : > { %s286_s17 = sshll.u32 %s285_s12, 4  ;;  %s2558_s30 = sshll.u32 %s3111_s25, 9  ;;  %s287_s17 = int_to_ptr.hbm [resolvable:$true] %s286_s17 }
  0x30   : > { %2753 = dma.hbm_to_vmem [thread:$0]  (!%p3269_p0), %s287_s17, 256, %s289_s14, %s274_s21, %s3125_s16, %s3552_s9, %s3551_s2  }
  0x31   : > { %s308_s19 = scalar_lea.hbm %s3526_s1, %s2558_s30  ;;  %s302_s0 = scalar_lea.vmem [#allocation6], %s1923_s11 }
  0x32   : > { %s309_s13 = sshll.u32 %s308_s19, 4  ;;  %s311_s3 = sshll.u32 %s302_s0, 4  ;;  %s310_s13 = int_to_ptr.hbm [resolvable:$true] %s309_s13  ;;  %s312_s3 = int_to_ptr.vmem [resolvable:$true] %s311_s3 }
  0x33   : > { %s299_s4 = scalar_lea.sflag [#allocation7], %s298_s29  ;;  %s3126_s5 = smov 256  }
  0x34   : > { %s3127_s18 = smov 16   ;;  %323 = sbr.rel (%p3211_p5) target bundleno = 911 (0x38f), region = 44 }
  0x35   : > { %2756 = dma.hbm_to_vmem [thread:$0]  (!%p3269_p0), %s310_s13, 8192, %s312_s3, %s299_s4, %s3126_s5, %s3126_s5, %s3127_s18  }
  0x36   : > { %s325_s2 = sand.u32 (!%p3211_p5), 1, %s3099_s22  }
  0x37   : > { %s1928_s16 = sshll.u32 (!%p3211_p5), %s325_s2, 4  ;;  %s326_s20 = scalar_lea.sflag (!%p3211_p5), [#allocation4], %s325_s2 }
  0x38   : > { %s3287_s14 = scalar_lea.vmem (!%p3211_p5), [#allocation3], %s1928_s16 }
  0x39   : > { %3070 = dma.done.wait (%p3204_p4), %s326_s20, 256  }
  0x3a   : > { %3072 = vsyncadd (%p3204_p4), %s326_s20, 4294967040  ;;  %s335_s0 = sand.u32 1, %s3196_s27   ;;  %s1929_s15 = sshll.u32 %s325_s2, 9 }
  0x3b   : > { %s336_s3 = scalar_lea.sflag [#allocation7], %s335_s0  ;;  %s3294_s4 = scalar_lea.vmem [#allocation6], %s1929_s15 }
  0x3c   : > { %3074 = dma.done.wait (%p3204_p4), %s336_s3, 8192  }
  0x3d   : > { %3076 = vsyncadd (%p3204_p4), %s336_s3, 4294959104 }
  0x3e   : > { %3078 = dma.done.wait (%p60_p1), [#allocation7], 8192  }
  0x3f   : > { %3080 = vsyncadd (%p60_p1), [#allocation7], 4294959104 }
  0x40   : > { %3082 = dma.done.wait (%p60_p1), [#allocation10], 3072  }
  0x41   : > { %3084 = vsyncadd (%p60_p1), [#allocation10], 4294964224 }
  0x42   : > { %3086 = dma.done.wait (%p60_p1), [#allocation13], 128  }
  0x43   : > { %3088 = vsyncadd (%p60_p1), [#allocation13], 4294967168  ;;  %p1934_p2 = scmp.ne.s32.totalorder %s3107_s24, 0 }
  0x45   : > { %396 = sbr.rel (%p1934_p2) target bundleno = 83 (0x53), region = 72 }
  0x4a   : > { %v3128_v0 = vmov 0.0  }
  0x4b   : > { %397 = vst [vmem:[#allocation2 + $0x30] sm:$0xff] %v3128_v0 }
  0x4c   : > { %398 = vst [vmem:[#allocation2] sm:$0xff] %v3128_v0 }
  0x4d   : > { %399 = vst [vmem:[#allocation2 + $0x18] sm:$0xff] %v3128_v0 }
  0x4e   : > { %400 = vst [vmem:[#allocation2 + $0x10] sm:$0xff] %v3128_v0 }
  0x4f   : > { %401 = vst [vmem:[#allocation2 + $0x8] sm:$0xff] %v3128_v0 }
  0x50   : > { %402 = vst [vmem:[#allocation2 + $0x20] sm:$0xff] %v3128_v0 }
  0x51   : > { %403 = vst [vmem:[#allocation2 + $0x28] sm:$0xff] %v3128_v0 }
  0x52   : > { %404 = vst [vmem:[#allocation2 + $0x38] sm:$0xff] %v3128_v0 }
  0x53 PF: > { %v2057_v1 = vld [vmem:[%s3294_s4 + $0xe0] sm:$0xf]  ;;  %v2591_v2 = vld [vmem:[%s3294_s4 + $0xec] sm:$0xf0]  ;;  %v2589_v6 = vld [vmem:[%s3294_s4 + $0xe4] sm:$0xf] }
  0x54   : > { %v2185_v3 = vld [vmem:[%s3294_s4 + $0x1e0] sm:$0xf]  ;;  %v2058_v4 = vor.u32 %v2591_v2, %v2057_v1  ;;  %v2623_v5 = vld [vmem:[%s3294_s4 + $0x1ec] sm:$0xf0]  ;;  %v2059_v7 = vld [vmem:[%s3294_s4 + $0xf0] sm:$0xf0] }
  0x55   : > { %v2186_v8 = vor.u32 %v2623_v5, %v2185_v3  ;;  %v2062_v9 = vor.u32 %v2589_v6, %v2059_v7  ;;  %v2621_v10 = vld [vmem:[%s3294_s4 + $0x1e4] sm:$0xf]  ;;  %v2187_v11 = vld [vmem:[%s3294_s4 + $0x1f0] sm:$0xf0]  ;;  %v2041_v12 = vld [vmem:[%s3294_s4 + $0xc0] sm:$0xf] }
  0x56   : > { %809 = vmatpush.bf16.msra.mxu0 %v2058_v4  ;;  %v2190_v13 = vor.u32 %v2621_v10, %v2187_v11  ;;  %v2587_v14 = vld [vmem:[%s3294_s4 + $0xcc] sm:$0xf0]  ;;  %v2169_v15 = vld [vmem:[%s3294_s4 + $0x1c0] sm:$0xf]  ;;  %v2585_v19 = vld [vmem:[%s3294_s4 + $0xc4] sm:$0xf] }
  0x57   : > { %v2619_v16 = vld [vmem:[%s3294_s4 + $0x1cc] sm:$0xf0]  ;;  %823 = vmatpush.bf16.msra.mxu1 %v2186_v8  ;;  %837 = vmatpush.bf16.msra.mxu2 %v2062_v9  ;;  %v2042_v17 = vor.u32 %v2587_v14, %v2041_v12  ;;  %v2043_v20 = vld [vmem:[%s3294_s4 + $0xd0] sm:$0xf0]  ;;  %v2617_v21 = vld [vmem:[%s3294_s4 + $0x1c4] sm:$0xf] }
  0x58   : > { %v2170_v18 = vor.u32 %v2619_v16, %v2169_v15  ;;  %851 = vmatpush.bf16.msra.mxu3 %v2190_v13  ;;  %v2046_v22 = vor.u32 %v2585_v19, %v2043_v20  ;;  %v2171_v23 = vld [vmem:[%s3294_s4 + $0x1d0] sm:$0xf0]  ;;  %v2025_v24 = vld [vmem:[%s3294_s4 + $0xa0] sm:$0xf]  ;;  %v2583_v25 = vld [vmem:[%s3294_s4 + $0xac] sm:$0xf0] }
  0x59   : > { %v2174_v26 = vor.u32 %v2617_v21, %v2171_v23  ;;  %v2153_v27 = vld [vmem:[%s3294_s4 + $0x1a0] sm:$0xf]  ;;  %v2615_v28 = vld [vmem:[%s3294_s4 + $0x1ac] sm:$0xf0]  ;;  %v2581_v29 = vld [vmem:[%s3294_s4 + $0xa4] sm:$0xf]  ;;  %v2026_v30 = vor.u32 %v2583_v25, %v2025_v24 }
  0x5a   : > { %810 = vmatpush.bf16.msra.mxu0 %v2042_v17  ;;  %v2027_v31 = vld [vmem:[%s3294_s4 + $0xb0] sm:$0xf0]  ;;  %v2613_v32 = vld [vmem:[%s3294_s4 + $0x1a4] sm:$0xf]  ;;  %v2154_v34 = vor.u32 %v2615_v28, %v2153_v27  ;;  %v2009_v36 = vld [vmem:[%s3294_s4 + $0x80] sm:$0xf] }
  0x5b   : > { %v2155_v33 = vld [vmem:[%s3294_s4 + $0x1b0] sm:$0xf0]  ;;  %824 = vmatpush.bf16.msra.mxu1 %v2170_v18  ;;  %838 = vmatpush.bf16.msra.mxu2 %v2046_v22  ;;  %v2030_v35 = vor.u32 %v2581_v29, %v2027_v31  ;;  %v2579_v37 = vld [vmem:[%s3294_s4 + $0x8c] sm:$0xf0]  ;;  %v2137_v38 = vld [vmem:[%s3294_s4 + $0x180] sm:$0xf] }
  0x5c   : > { %852 = vmatpush.bf16.msra.mxu3 %v2174_v26  ;;  %v2158_v39 = vor.u32 %v2613_v32, %v2155_v33  ;;  %v2611_v40 = vld [vmem:[%s3294_s4 + $0x18c] sm:$0xf0]  ;;  %v2577_v41 = vld [vmem:[%s3294_s4 + $0x84] sm:$0xf]  ;;  %v2011_v42 = vld [vmem:[%s3294_s4 + $0x90] sm:$0xf0]  ;;  %v2010_v45 = vor.u32 %v2579_v37, %v2009_v36 }
  0x5d   : > { %v2609_v43 = vld [vmem:[%s3294_s4 + $0x184] sm:$0xf]  ;;  %v2139_v44 = vld [vmem:[%s3294_s4 + $0x190] sm:$0xf0]  ;;  %v2138_v46 = vor.u32 %v2611_v40, %v2137_v38  ;;  %v2014_v47 = vor.u32 %v2577_v41, %v2011_v42  ;;  %v1993_v48 = vld [vmem:[%s3294_s4 + $0x60] sm:$0xf] }
  0x5e   : > { %811 = vmatpush.bf16.msra.mxu0 %v2026_v30  ;;  %v2575_v49 = vld [vmem:[%s3294_s4 + $0x6c] sm:$0xf0]  ;;  %v2121_v50 = vld [vmem:[%s3294_s4 + $0x160] sm:$0xf]  ;;  %v2142_v51 = vor.u32 %v2609_v43, %v2139_v44  ;;  %v2573_v53 = vld [vmem:[%s3294_s4 + $0x64] sm:$0xf] }
  0x5f   : > { %825 = vmatpush.bf16.msra.mxu1 %v2154_v34  ;;  %839 = vmatpush.bf16.msra.mxu2 %v2030_v35  ;;  %v2607_v52 = vld [vmem:[%s3294_s4 + $0x16c] sm:$0xf0]  ;;  %v1995_v54 = vld [vmem:[%s3294_s4 + $0x70] sm:$0xf0]  ;;  %v2605_v55 = vld [vmem:[%s3294_s4 + $0x164] sm:$0xf]  ;;  %v1994_v57 = vor.u32 %v2575_v49, %v1993_v48 }
  0x60   : > { %853 = vmatpush.bf16.msra.mxu3 %v2158_v39  ;;  %v2123_v56 = vld [vmem:[%s3294_s4 + $0x170] sm:$0xf0]  ;;  %v2122_v58 = vor.u32 %v2607_v52, %v2121_v50  ;;  %v1998_v59 = vor.u32 %v2573_v53, %v1995_v54  ;;  %v1977_v60 = vld [vmem:[%s3294_s4 + $0x40] sm:$0xf]  ;;  %v2571_v61 = vld [vmem:[%s3294_s4 + $0x4c] sm:$0xf0] }
  0x61   : > { %v2105_v62 = vld [vmem:[%s3294_s4 + $0x140] sm:$0xf]  ;;  %v2126_v63 = vor.u32 %v2605_v55, %v2123_v56  ;;  %v2603_v0 = vld [vmem:[%s3294_s4 + $0x14c] sm:$0xf0]  ;;  %v2569_v1 = vld [vmem:[%s3294_s4 + $0x44] sm:$0xf]  ;;  %v1978_v5 = vor.u32 %v2571_v61, %v1977_v60 }
  0x62   : > { %812 = vmatpush.bf16.msra.mxu0 %v2010_v45  ;;  %v1979_v2 = vld [vmem:[%s3294_s4 + $0x50] sm:$0xf0]  ;;  %v2601_v3 = vld [vmem:[%s3294_s4 + $0x144] sm:$0xf]  ;;  %v2106_v6 = vor.u32 %v2603_v0, %v2105_v62  ;;  %v1961_v8 = vld [vmem:[%s3294_s4 + $0x20] sm:$0xf] }
  0x63   : > { %826 = vmatpush.bf16.msra.mxu1 %v2138_v46  ;;  %840 = vmatpush.bf16.msra.mxu2 %v2014_v47  ;;  %v2107_v4 = vld [vmem:[%s3294_s4 + $0x150] sm:$0xf0]  ;;  %v1982_v7 = vor.u32 %v2569_v1, %v1979_v2  ;;  %v2567_v9 = vld [vmem:[%s3294_s4 + $0x2c] sm:$0xf0]  ;;  %v2089_v10 = vld [vmem:[%s3294_s4 + $0x120] sm:$0xf] }
  0x64   : > { %854 = vmatpush.bf16.msra.mxu3 %v2142_v51  ;;  %v2110_v11 = vor.u32 %v2601_v3, %v2107_v4  ;;  %v2599_v12 = vld [vmem:[%s3294_s4 + $0x12c] sm:$0xf0]  ;;  %v2565_v13 = vld [vmem:[%s3294_s4 + $0x24] sm:$0xf]  ;;  %v1963_v14 = vld [vmem:[%s3294_s4 + $0x30] sm:$0xf0]  ;;  %v1962_v17 = vor.u32 %v2567_v9, %v1961_v8 }
  0x65   : > { %v2597_v15 = vld [vmem:[%s3294_s4 + $0x124] sm:$0xf]  ;;  %v2091_v16 = vld [vmem:[%s3294_s4 + $0x130] sm:$0xf0]  ;;  %v1945_v18 = vld [vmem:[%s3294_s4] sm:$0xf]  ;;  %v2090_v21 = vor.u32 %v2599_v12, %v2089_v10  ;;  %v1966_v22 = vor.u32 %v2565_v13, %v1963_v14 }
  0x66   : > { %813 = vmatpush.bf16.msra.mxu0 %v1994_v57  ;;  %v2563_v19 = vld [vmem:[%s3294_s4 + $0xc] sm:$0xf0]  ;;  %v2073_v20 = vld [vmem:[%s3294_s4 + $0x100] sm:$0xf]  ;;  %v2561_v24 = vld [vmem:[%s3294_s4 + $0x4] sm:$0xf]  ;;  %v2094_v26 = vor.u32 %v2597_v15, %v2091_v16 }
  0x67   : > { %827 = vmatpush.bf16.msra.mxu1 %v2122_v58  ;;  %841 = vmatpush.bf16.msra.mxu2 %v1998_v59  ;;  %v2595_v23 = vld [vmem:[%s3294_s4 + $0x10c] sm:$0xf0]  ;;  %v1947_v25 = vld [vmem:[%s3294_s4 + $0x10] sm:$0xf0]  ;;  %v2593_v27 = vld [vmem:[%s3294_s4 + $0x104] sm:$0xf]  ;;  %v1946_v33 = vor.u32 %v2563_v19, %v1945_v18 }
  0x68   : > { %855 = vmatpush.bf16.msra.mxu3 %v2126_v63  ;;  %v2075_v28 = vld [vmem:[%s3294_s4 + $0x110] sm:$0xf0]  ;;  %v2065_v29 = vld [vmem:[%s3294_s4 + $0xe8] sm:$0xf]  ;;  %v2592_v30 = vld [vmem:[%s3294_s4 + $0xf4] sm:$0xf0]  ;;  %v2074_v37 = vor.u32 %v2595_v23, %v2073_v20  ;;  %v1950_v38 = vor.u32 %v2561_v24, %v1947_v25 }
  0x69   : > { %v2193_v31 = vld [vmem:[%s3294_s4 + $0x1e8] sm:$0xf]  ;;  %v2624_v32 = vld [vmem:[%s3294_s4 + $0x1f4] sm:$0xf0]  ;;  %v2590_v34 = vld [vmem:[%s3294_s4 + $0xec] sm:$0xf]  ;;  %v2078_v42 = vor.u32 %v2593_v27, %v2075_v28  ;;  %v2066_v43 = vor.u32 %v2592_v30, %v2065_v29 }
  0x6a   : > { %814 = vmatpush.bf16.msra.mxu0 %v1978_v5  ;;  %v2067_v35 = vld [vmem:[%s3294_s4 + $0xf8] sm:$0xf0]  ;;  %v2622_v36 = vld [vmem:[%s3294_s4 + $0x1ec] sm:$0xf]  ;;  %v1937_v40 = vld [vmem:[%s3287_s14] sm:$0xf]  ;;  %v2194_v46 = vor.u32 %v2624_v32, %v2193_v31 }
  0x6b   : > { %828 = vmatpush.bf16.msra.mxu1 %v2106_v6  ;;  %842 = vmatpush.bf16.msra.mxu2 %v1982_v7  ;;  %v2195_v39 = vld [vmem:[%s3294_s4 + $0x1f8] sm:$0xf0]  ;;  %v2560_v41 = vld [vmem:[%s3287_s14 + $0x4] sm:$0xf0]  ;;  %v2559_v44 = vld [vmem:[%s3287_s14 + $0x4] sm:$0xf]  ;;  %v2070_v47 = vor.u32 %v2590_v34, %v2067_v35 }
  0x6c   : > { %856 = vmatpush.bf16.msra.mxu3 %v2110_v11  ;;  %v1939_v45 = vld [vmem:[%s3287_s14 + $0x8] sm:$0xf0]  ;;  %v2049_v48 = vld [vmem:[%s3294_s4 + $0xc8] sm:$0xf]  ;;  %v2588_v49 = vld [vmem:[%s3294_s4 + $0xd4] sm:$0xf0]  ;;  %v2198_v51 = vor.u32 %v2622_v36, %v2195_v39  ;;  %v3395_v55 = vor.u32 %v2560_v41, %v1937_v40 }
  0x6d   : > { %v2177_v50 = vld [vmem:[%s3294_s4 + $0x1c8] sm:$0xf]  ;;  %v2620_v52 = vld [vmem:[%s3294_s4 + $0x1d4] sm:$0xf0]  ;;  %v2586_v53 = vld [vmem:[%s3294_s4 + $0xcc] sm:$0xf]  ;;  %v3399_v58 = vor.u32 %v2559_v44, %v1939_v45  ;;  %v2050_v59 = vor.u32 %v2588_v49, %v2049_v48 }
  0x6e   : > { %815 = vmatpush.bf16.msra.mxu0 %v1962_v17  ;;  %v2051_v54 = vld [vmem:[%s3294_s4 + $0xd8] sm:$0xf0]  ;;  %v2618_v56 = vld [vmem:[%s3294_s4 + $0x1cc] sm:$0xf]  ;;  %v2178_v60 = vor.u32 %v2620_v52, %v2177_v50  ;;  %v2033_v62 = vld [vmem:[%s3294_s4 + $0xa8] sm:$0xf] }
  0x6f   : > { %829 = vmatpush.bf16.msra.mxu1 %v2090_v21  ;;  %843 = vmatpush.bf16.msra.mxu2 %v1966_v22  ;;  %v2179_v57 = vld [vmem:[%s3294_s4 + $0x1d8] sm:$0xf0]  ;;  %v2054_v61 = vor.u32 %v2586_v53, %v2051_v54  ;;  %v2584_v63 = vld [vmem:[%s3294_s4 + $0xb4] sm:$0xf0]  ;;  %v2161_v0 = vld [vmem:[%s3294_s4 + $0x1a8] sm:$0xf] }
  0x70   : > { %857 = vmatpush.bf16.msra.mxu3 %v2094_v26  ;;  %v2182_v1 = vor.u32 %v2618_v56, %v2179_v57  ;;  %v2616_v2 = vld [vmem:[%s3294_s4 + $0x1b4] sm:$0xf0]  ;;  %v2582_v3 = vld [vmem:[%s3294_s4 + $0xac] sm:$0xf]  ;;  %v2035_v4 = vld [vmem:[%s3294_s4 + $0xb8] sm:$0xf0]  ;;  %v2034_v7 = vor.u32 %v2584_v63, %v2033_v62 }
  0x71   : > { %v2614_v5 = vld [vmem:[%s3294_s4 + $0x1ac] sm:$0xf]  ;;  %v2163_v6 = vld [vmem:[%s3294_s4 + $0x1b8] sm:$0xf0]  ;;  %v2162_v8 = vor.u32 %v2616_v2, %v2161_v0  ;;  %v2038_v9 = vor.u32 %v2582_v3, %v2035_v4  ;;  %v2017_v10 = vld [vmem:[%s3294_s4 + $0x88] sm:$0xf] }
  0x72   : > { %816 = vmatpush.bf16.msra.mxu0 %v1946_v33  ;;  %v2580_v11 = vld [vmem:[%s3294_s4 + $0x94] sm:$0xf0]  ;;  %v2145_v12 = vld [vmem:[%s3294_s4 + $0x188] sm:$0xf]  ;;  %v2166_v13 = vor.u32 %v2614_v5, %v2163_v6  ;;  %v2578_v15 = vld [vmem:[%s3294_s4 + $0x8c] sm:$0xf] }
  0x73   : > { %830 = vmatpush.bf16.msra.mxu1 %v2074_v37  ;;  %844 = vmatpush.bf16.msra.mxu2 %v1950_v38  ;;  %v2612_v14 = vld [vmem:[%s3294_s4 + $0x194] sm:$0xf0]  ;;  %v2019_v16 = vld [vmem:[%s3294_s4 + $0x98] sm:$0xf0]  ;;  %v2610_v17 = vld [vmem:[%s3294_s4 + $0x18c] sm:$0xf]  ;;  %v2018_v19 = vor.u32 %v2580_v11, %v2017_v10 }
  0x74   : > { %858 = vmatpush.bf16.msra.mxu3 %v2078_v42  ;;  %v2147_v18 = vld [vmem:[%s3294_s4 + $0x198] sm:$0xf0]  ;;  %v2146_v20 = vor.u32 %v2612_v14, %v2145_v12  ;;  %v2022_v21 = vor.u32 %v2578_v15, %v2019_v16  ;;  %v2001_v22 = vld [vmem:[%s3294_s4 + $0x68] sm:$0xf]  ;;  %v2576_v23 = vld [vmem:[%s3294_s4 + $0x74] sm:$0xf0] }
  0x75   : > { %817 = vmatmul.bf16.vlgmr.msra.gmra.mxu0 %v3395_v55  ;;  %v2129_v24 = vld [vmem:[%s3294_s4 + $0x168] sm:$0xf]  ;;  %v2150_v25 = vor.u32 %v2610_v17, %v2147_v18  ;;  %v2608_v26 = vld [vmem:[%s3294_s4 + $0x174] sm:$0xf0]  ;;  %v2574_v27 = vld [vmem:[%s3294_s4 + $0x6c] sm:$0xf]  ;;  %v2002_v31 = vor.u32 %v2576_v23, %v2001_v22 }
  0x76   : > { %865 = vmatpush.bf16.msrb.mxu0 %v2066_v43  ;;  %845 = vmatmul.bf16.vlgmr.msra.gmra.mxu2 %v3395_v55  ;;  %v2003_v28 = vld [vmem:[%s3294_s4 + $0x78] sm:$0xf0]  ;;  %v2606_v29 = vld [vmem:[%s3294_s4 + $0x16c] sm:$0xf]  ;;  %v2130_v32 = vor.u32 %v2608_v26, %v2129_v24  ;;  %v1985_v34 = vld [vmem:[%s3294_s4 + $0x48] sm:$0xf] }
  0x77   : > { %879 = vmatpush.bf16.msrb.mxu1 %v2194_v46  ;;  %893 = vmatpush.bf16.msrb.mxu2 %v2070_v47  ;;  %v2131_v30 = vld [vmem:[%s3294_s4 + $0x178] sm:$0xf0]  ;;  %v2006_v33 = vor.u32 %v2574_v27, %v2003_v28  ;;  %v2572_v35 = vld [vmem:[%s3294_s4 + $0x54] sm:$0xf0]  ;;  %v2113_v36 = vld [vmem:[%s3294_s4 + $0x148] sm:$0xf] }
  0x78   : > { %907 = vmatpush.bf16.msrb.mxu3 %v2198_v51  ;;  %831 = vmatmul.bf16.vlgmr.msra.gmra.mxu1 %v3399_v58  ;;  %v2134_v37 = vor.u32 %v2606_v29, %v2131_v30  ;;  %v2604_v38 = vld [vmem:[%s3294_s4 + $0x154] sm:$0xf0]  ;;  %v2570_v39 = vld [vmem:[%s3294_s4 + $0x4c] sm:$0xf]  ;;  %v1987_v40 = vld [vmem:[%s3294_s4 + $0x58] sm:$0xf0]  ;;  %v1986_v43 = vor.u32 %v2572_v35, %v1985_v34 }
  0x79   : > { %859 = vmatmul.bf16.vlgmr.msra.gmra.mxu3 %v3399_v58  ;;  %v2602_v41 = vld [vmem:[%s3294_s4 + $0x14c] sm:$0xf]  ;;  %v2115_v42 = vld [vmem:[%s3294_s4 + $0x158] sm:$0xf0]  ;;  %v2114_v44 = vor.u32 %v2604_v38, %v2113_v36  ;;  %v1990_v45 = vor.u32 %v2570_v39, %v1987_v40  ;;  %v1969_v46 = vld [vmem:[%s3294_s4 + $0x28] sm:$0xf] }
  0x7a   : > { %866 = vmatpush.bf16.msrb.mxu0 %v2050_v59  ;;  %v2568_v47 = vld [vmem:[%s3294_s4 + $0x34] sm:$0xf0]  ;;  %v2097_v48 = vld [vmem:[%s3294_s4 + $0x128] sm:$0xf]  ;;  %v2118_v49 = vor.u32 %v2602_v41, %v2115_v42  ;;  %v2566_v51 = vld [vmem:[%s3294_s4 + $0x2c] sm:$0xf] }
  0x7b   : > { %880 = vmatpush.bf16.msrb.mxu1 %v2178_v60  ;;  %894 = vmatpush.bf16.msrb.mxu2 %v2054_v61  ;;  %v2600_v50 = vld [vmem:[%s3294_s4 + $0x134] sm:$0xf0]  ;;  %v1971_v52 = vld [vmem:[%s3294_s4 + $0x38] sm:$0xf0]  ;;  %v2598_v53 = vld [vmem:[%s3294_s4 + $0x12c] sm:$0xf]  ;;  %v1970_v56 = vor.u32 %v2568_v47, %v1969_v46 }
  0x7c   : > { %908 = vmatpush.bf16.msrb.mxu3 %v2182_v1  ;;  %v2099_v54 = vld [vmem:[%s3294_s4 + $0x138] sm:$0xf0]  ;;  %v2098_v57 = vor.u32 %v2600_v50, %v2097_v48  ;;  %v1974_v59 = vor.u32 %v2566_v51, %v1971_v52  ;;  %v1953_v60 = vld [vmem:[%s3294_s4 + $0x8] sm:$0xf]  ;;  %v2564_v61 = vld [vmem:[%s3294_s4 + $0x14] sm:$0xf0] }
  0x7d   : > { %v2081_v62 = vld [vmem:[%s3294_s4 + $0x108] sm:$0xf]  ;;  %v2102_v63 = vor.u32 %v2598_v53, %v2099_v54  ;;  %v2596_v0 = vld [vmem:[%s3294_s4 + $0x114] sm:$0xf0]  ;;  %v2562_v1 = vld [vmem:[%s3294_s4 + $0xc] sm:$0xf]  ;;  %v1954_v5 = vor.u32 %v2564_v61, %v1953_v60 }
  0x7e   : > { %867 = vmatpush.bf16.msrb.mxu0 %v2034_v7  ;;  %v1955_v2 = vld [vmem:[%s3294_s4 + $0x18] sm:$0xf0]  ;;  %v2594_v3 = vld [vmem:[%s3294_s4 + $0x10c] sm:$0xf]  ;;  %v2082_v6 = vor.u32 %v2596_v0, %v2081_v62  ;;  %v405_v10 = vld [vmem:[#allocation2 + $0x30] sm:$0xff]  ;;  %p2199_p1 = scmp.ne.s32.totalorder %s3107_s24, 2 }
  0x7f   : > { %881 = vmatpush.bf16.msrb.mxu1 %v2162_v8  ;;  %895 = vmatpush.bf16.msrb.mxu2 %v2038_v9  ;;  %v2083_v4 = vld [vmem:[%s3294_s4 + $0x118] sm:$0xf0]  ;;  %v1958_v7 = vor.u32 %v2562_v1, %v1955_v2  ;;  %v406_v15 = vld [vmem:[#allocation2] sm:$0xff] }
  0x80   : > { %909 = vmatpush.bf16.msrb.mxu3 %v2166_v13  ;;  %v2086_v8 = vor.u32 %v2594_v3, %v2083_v4  ;;  %v407_v28 = vld [vmem:[#allocation2 + $0x18] sm:$0xff] }
  0x82   : > { %868 = vmatpush.bf16.msrb.mxu0 %v2018_v19 }
  0x83   : > { %882 = vmatpush.bf16.msrb.mxu1 %v2146_v20  ;;  %896 = vmatpush.bf16.msrb.mxu2 %v2022_v21  ;;  %v409_v20 = vld [vmem:[#allocation2 + $0x8] sm:$0xff] }
  0x84   : > { %910 = vmatpush.bf16.msrb.mxu3 %v2150_v25 }
  0x86   : > { %869 = vmatpush.bf16.msrb.mxu0 %v2002_v31 }
  0x87   : > { %883 = vmatpush.bf16.msrb.mxu1 %v2130_v32  ;;  %897 = vmatpush.bf16.msrb.mxu2 %v2006_v33  ;;  %v408_v33 = vld [vmem:[#allocation2 + $0x10] sm:$0xff] }
  0x88   : > { %911 = vmatpush.bf16.msrb.mxu3 %v2134_v37  ;;  %v411_v37 = vld [vmem:[#allocation2 + $0x28] sm:$0xff] }
  0x8a   : > { %870 = vmatpush.bf16.msrb.mxu0 %v1986_v43  ;;  %v412_v43 = vld [vmem:[#allocation2 + $0x38] sm:$0xff] }
  0x8b   : > { %884 = vmatpush.bf16.msrb.mxu1 %v2114_v44  ;;  %898 = vmatpush.bf16.msrb.mxu2 %v1990_v45 }
  0x8c   : > { %912 = vmatpush.bf16.msrb.mxu3 %v2118_v49 }
  0x8e   : > { %871 = vmatpush.bf16.msrb.mxu0 %v1970_v56 }
  0x8f   : > { %885 = vmatpush.bf16.msrb.mxu1 %v2098_v57  ;;  %899 = vmatpush.bf16.msrb.mxu2 %v1974_v59 }
  0x90   : > { %913 = vmatpush.bf16.msrb.mxu3 %v2102_v63 }
  0x92   : > { %872 = vmatpush.bf16.msrb.mxu0 %v1954_v5 }
  0x93   : > { %886 = vmatpush.bf16.msrb.mxu1 %v2082_v6  ;;  %900 = vmatpush.bf16.msrb.mxu2 %v1958_v7 }
  0x94   : > { %914 = vmatpush.bf16.msrb.mxu3 %v2086_v8 }
  0x95   : > { %873 = vmatmul.bf16.vlgmr.msrb.gmra.mxu0 %v3395_v55 }
  0x96   : > { %887 = vmatmul.bf16.vlgmr.msrb.gmra.mxu1 %v3399_v58  ;;  %901 = vmatmul.bf16.vlgmr.msrb.gmra.mxu2 %v3395_v55 }
  0x97   : > { %915 = vmatmul.bf16.vlgmr.msrb.gmra.mxu3 %v3399_v58  ;;  %v410_v58 = vld [vmem:[#allocation2 + $0x20] sm:$0xff] }
  0xf2   : > { %v818_v9 = vpop.f32.mrf.mxu0 }
  0xf5   : > { %v832_v11 = vpop.f32.mrf.mxu1 }
  0xf6   : > { %v833_v12 = vadd.f32 %v832_v11, %v818_v9 }
  0xf8   : > { %v921_v13 = vadd.f32 %v833_v12, %v405_v10 }
  0xf9   : > { %v846_v14 = vpop.f32.mrf.mxu2 }
  0xfa   : > { %929 = vst [vmem:[#allocation2 + $0x30] sm:$0xff] %v921_v13  ;;  %v820_v18 = vpop.f32.mrf.mxu0 }
  0xfc   : > { %v860_v16 = vpop.f32.mrf.mxu3 }
  0xfd   : > { %v861_v17 = vadd.f32 %v860_v16, %v846_v14  ;;  %v834_v21 = vpop.f32.mrf.mxu1 }
  0xfe   : > { %v835_v22 = vadd.f32 %v834_v21, %v820_v18 }
  0xff   : > { %v922_v19 = vadd.f32 %v861_v17, %v406_v15 }
 0x100   : > { %v925_v23 = vadd.f32 %v835_v22, %v409_v20 }
 0x101   : > { %930 = vst [vmem:[#allocation2] sm:$0xff] %v922_v19  ;;  %v848_v55 = vpop.f32.mrf.mxu2 }
 0x102   : > { %933 = vst [vmem:[#allocation2 + $0x8] sm:$0xff] %v925_v23 }
 0x104   : > { %v862_v24 = vpop.f32.mrf.mxu3 }
 0x105   : > { %v863_v25 = vadd.f32 %v862_v24, %v848_v55 }
 0x107   : > { %v926_v26 = vadd.f32 %v863_v25, %v410_v58 }
 0x109   : > { %934 = vst [vmem:[#allocation2 + $0x20] sm:$0xff] %v926_v26 }
 0x112   : > { %v874_v27 = vpop.f32.mrf.mxu0 }
 0x113   : > { %v888_v29 = vpop.f32.mrf.mxu1 }
 0x114   : > { %v889_v30 = vadd.f32 %v888_v29, %v874_v27 }
 0x116   : > { %v923_v31 = vadd.f32 %v889_v30, %v407_v28 }
 0x118   : > { %931 = vst [vmem:[#allocation2 + $0x18] sm:$0xff] %v923_v31 }
 0x119   : > { %v902_v32 = vpop.f32.mrf.mxu2 }
 0x11a   : > { %v916_v34 = vpop.f32.mrf.mxu3  ;;  %v876_v35 = vpop.f32.mrf.mxu0 }
 0x11b   : > { %v917_v36 = vadd.f32 %v916_v34, %v902_v32  ;;  %v890_v38 = vpop.f32.mrf.mxu1 }
 0x11c   : > { %v891_v39 = vadd.f32 %v890_v38, %v876_v35 }
 0x11d   : > { %v924_v40 = vadd.f32 %v917_v36, %v408_v33 }
 0x11e   : > { %v927_v41 = vadd.f32 %v891_v39, %v411_v37 }
 0x11f   : > { %932 = vst [vmem:[#allocation2 + $0x10] sm:$0xff] %v924_v40 }
 0x120   : > { %935 = vst [vmem:[#allocation2 + $0x28] sm:$0xff] %v927_v41 }
 0x121   : > { %v904_v42 = vpop.f32.mrf.mxu2 }
 0x122   : > { %v918_v44 = vpop.f32.mrf.mxu3 }
 0x123   : > { %v919_v45 = vadd.f32 %v918_v44, %v904_v42  ;;  %940 = sbr.rel (%p2199_p1) target bundleno = 905 (0x389), region = 76 }
 0x125   : > { %v928_v46 = vadd.f32 %v919_v45, %v412_v43 }
 0x127   : > { %936 = vst [vmem:[#allocation2 + $0x38] sm:$0xff] %v928_v46 }
 0x128   : > { %v941_v47 = vld [vmem:[#allocation12] sm:$0xf]  ;;  %v945_v48 = vld [vmem:[#allocation2 + $0x30] sm:$0xff]  ;;  %v947_v50 = vld [vmem:[#allocation2 + $0x18] sm:$0xff] }
 0x129   : > { %v946_v49 = vld [vmem:[#allocation2] sm:$0xff]  ;;  %v948_v51 = vld [vmem:[#allocation2 + $0x10] sm:$0xff]  ;;  %v954_v52 = vperm.slane %v941_v47, 0  ;;  %v955_v53 = vperm.slane %v941_v47, 1  ;;  %v956_v54 = vperm.slane %v941_v47, 2  ;;  %v957_v56 = vperm.slane %v941_v47, 3 }
 0x12a   : > { %v949_v57 = vld [vmem:[#allocation2 + $0x8] sm:$0xff]  ;;  %v950_v59 = vld [vmem:[#allocation2 + $0x20] sm:$0xff]  ;;  %v2258_v2 = vld [vmem:[#allocation8 + $0x70] sm:$0xf] }
 0x12b   : > { %v951_v60 = vld [vmem:[#allocation2 + $0x28] sm:$0xff]  ;;  %v3458_v61 = vadd.f32 %v954_v52, %v945_v48  ;;  %v3460_v62 = vadd.f32 %v955_v53, %v946_v49  ;;  %v3462_v63 = vadd.f32 %v956_v54, %v947_v50  ;;  %v3464_v0 = vadd.f32 %v957_v56, %v948_v51  ;;  %v2640_v3 = vld [vmem:[#allocation8 + $0x74] sm:$0xf0]  ;;  %v2322_v7 = vld [vmem:[#allocation8 + $0xf0] sm:$0xf] }
 0x12c   : > { %v3466_v4 = vadd.f32 %v954_v52, %v949_v57  ;;  %v3468_v5 = vadd.f32 %v955_v53, %v950_v59  ;;  %v3470_v6 = vadd.f32 %v956_v54, %v951_v60  ;;  %v2656_v8 = vld [vmem:[#allocation8 + $0xf4] sm:$0xf0]  ;;  %v2386_v9 = vld [vmem:[#allocation8 + $0x170] sm:$0xf]  ;;  %v2250_v19 = vld [vmem:[#allocation8 + $0x60] sm:$0xf]  ;;  %v2259_v23 = vor.u32 %v2640_v3, %v2258_v2 }
 0x12d   : > { %v970_v10 = vmul.f32 %v3458_v61, %v3458_v61  ;;  %v971_v11 = vmul.f32 %v3460_v62, %v3460_v62  ;;  %v972_v12 = vmul.f32 %v3462_v63, %v3462_v63  ;;  %v2672_v13 = vld [vmem:[#allocation8 + $0x174] sm:$0xf0]  ;;  %v2450_v14 = vld [vmem:[#allocation8 + $0x1f0] sm:$0xf]  ;;  %v973_v16 = vmul.f32 %v3464_v0, %v3464_v0  ;;  %v2638_v20 = vld [vmem:[#allocation8 + $0x64] sm:$0xf0] }
 0x12e   : > { %v952_v1 = vld [vmem:[#allocation2 + $0x38] sm:$0xff]  ;;  %v974_v17 = vmul.f32 %v3466_v4, %v3466_v4  ;;  %v975_v18 = vmul.f32 %v3468_v5, %v3468_v5  ;;  %v2314_v21 = vld [vmem:[#allocation8 + $0xe0] sm:$0xf]  ;;  %v2323_v55 = vor.u32 %v2656_v8, %v2322_v7  ;;  %v2387_v58 = vor.u32 %v2672_v13, %v2386_v9  ;;  %v2654_v24 = vld [vmem:[#allocation8 + $0xe4] sm:$0xf0]  ;;  %1411 = vmatpush.bf16.msra.mxu0 %v2259_v23 }
 0x12f   : > { %v2688_v15 = vld [vmem:[#allocation8 + $0x1f4] sm:$0xf0]  ;;  %v978_v22 = vadd.f32 %v971_v11, %v970_v10  ;;  %v2378_v25 = vld [vmem:[#allocation8 + $0x160] sm:$0xf]  ;;  %v2670_v26 = vld [vmem:[#allocation8 + $0x164] sm:$0xf0]  ;;  %v3484_v27 = vadd.f32 %v957_v56, %v952_v1  ;;  %v976_v28 = vmul.f32 %v3470_v6, %v3470_v6  ;;  %v2251_v34 = vor.u32 %v2638_v20, %v2250_v19 }
 0x130   : > { %v2451_v29 = vor.u32 %v2688_v15, %v2450_v14  ;;  %v2442_v30 = vld [vmem:[#allocation8 + $0x1e0] sm:$0xf]  ;;  %v2686_v31 = vld [vmem:[#allocation8 + $0x1e4] sm:$0xf0]  ;;  %v983_v33 = vadd.f32 %v975_v18, %v974_v17  ;;  %1425 = vmatpush.bf16.msra.mxu1 %v2323_v55  ;;  %v2242_v35 = vld [vmem:[#allocation8 + $0x50] sm:$0xf]  ;;  %1439 = vmatpush.bf16.msra.mxu2 %v2387_v58  ;;  %v2315_v37 = vor.u32 %v2654_v24, %v2314_v21 }
 0x131   : > { %v979_v32 = vadd.f32 %v978_v22, %v972_v12  ;;  %v2636_v36 = vld [vmem:[#allocation8 + $0x54] sm:$0xf0]  ;;  %v2379_v38 = vor.u32 %v2670_v26, %v2378_v25  ;;  %v2306_v39 = vld [vmem:[#allocation8 + $0xd0] sm:$0xf]  ;;  %v2443_v43 = vor.u32 %v2686_v31, %v2442_v30  ;;  %v977_v47 = vmul.f32 %v3484_v27, %v3484_v27  ;;  %v2234_v54 = vld [vmem:[#allocation8 + $0x40] sm:$0xf] }
 0x132   : > { %1453 = vmatpush.bf16.msra.mxu3 %v2451_v29  ;;  %v2652_v40 = vld [vmem:[#allocation8 + $0xd4] sm:$0xf0]  ;;  %v2370_v41 = vld [vmem:[#allocation8 + $0x150] sm:$0xf]  ;;  %v984_v48 = vadd.f32 %v983_v33, %v976_v28  ;;  %1412 = vmatpush.bf16.msra.mxu0 %v2251_v34  ;;  %v2243_v49 = vor.u32 %v2636_v36, %v2242_v35  ;;  %v2634_v56 = vld [vmem:[#allocation8 + $0x44] sm:$0xf0] }
 0x133   : > { %v980_v42 = vadd.f32 %v979_v32, %v973_v16  ;;  %v2668_v44 = vld [vmem:[#allocation8 + $0x154] sm:$0xf0]  ;;  %v2434_v45 = vld [vmem:[#allocation8 + $0x1d0] sm:$0xf]  ;;  %v2307_v50 = vor.u32 %v2652_v40, %v2306_v39  ;;  %v2298_v57 = vld [vmem:[#allocation8 + $0xc0] sm:$0xf]  ;;  %v2235_v59 = vor.u32 %v2634_v56, %v2234_v54 }
 0x134   : > { %v2684_v46 = vld [vmem:[#allocation8 + $0x1d4] sm:$0xf0]  ;;  %1426 = vmatpush.bf16.msra.mxu1 %v2315_v37  ;;  %1440 = vmatpush.bf16.msra.mxu2 %v2379_v38  ;;  %v2371_v51 = vor.u32 %v2668_v44, %v2370_v41  ;;  %v985_v53 = vadd.f32 %v984_v48, %v977_v47  ;;  %v2650_v60 = vld [vmem:[#allocation8 + $0xc4] sm:$0xf0]  ;;  %v2362_v1 = vld [vmem:[#allocation8 + $0x140] sm:$0xf] }
 0x135   : > { %981 = vadd.xlane.f32.xlu0 %v980_v42  ;;  %v2435_v52 = vor.u32 %v2684_v46, %v2434_v45  ;;  %v2666_v2 = vld [vmem:[#allocation8 + $0x144] sm:$0xf0]  ;;  %v2299_v3 = vor.u32 %v2650_v60, %v2298_v57  ;;  %v2426_v8 = vld [vmem:[#allocation8 + $0x1c0] sm:$0xf]  ;;  %v2226_v11 = vld [vmem:[#allocation8 + $0x30] sm:$0xf] }
 0x136   : > { %1454 = vmatpush.bf16.msra.mxu3 %v2443_v43  ;;  %1413 = vmatpush.bf16.msra.mxu0 %v2243_v49  ;;  %v2363_v7 = vor.u32 %v2666_v2, %v2362_v1  ;;  %v2682_v9 = vld [vmem:[#allocation8 + $0x1c4] sm:$0xf0]  ;;  %v2632_v12 = vld [vmem:[#allocation8 + $0x34] sm:$0xf0]  ;;  %v2290_v13 = vld [vmem:[#allocation8 + $0xb0] sm:$0xf] }
 0x137   : > { %v2427_v10 = vor.u32 %v2682_v9, %v2426_v8  ;;  %v2227_v14 = vor.u32 %v2632_v12, %v2226_v11  ;;  %v2648_v15 = vld [vmem:[#allocation8 + $0xb4] sm:$0xf0]  ;;  %v2354_v16 = vld [vmem:[#allocation8 + $0x130] sm:$0xf]  ;;  %v2218_v23 = vld [vmem:[#allocation8 + $0x20] sm:$0xf] }
 0x138   : > { %1427 = vmatpush.bf16.msra.mxu1 %v2307_v50  ;;  %1441 = vmatpush.bf16.msra.mxu2 %v2371_v51  ;;  %v2664_v17 = vld [vmem:[#allocation8 + $0x134] sm:$0xf0]  ;;  %v2291_v18 = vor.u32 %v2648_v15, %v2290_v13  ;;  %v2418_v20 = vld [vmem:[#allocation8 + $0x1b0] sm:$0xf]  ;;  %v2630_v55 = vld [vmem:[#allocation8 + $0x24] sm:$0xf0] }
 0x139   : > { %v2355_v19 = vor.u32 %v2664_v17, %v2354_v16  ;;  %v2680_v21 = vld [vmem:[#allocation8 + $0x1b4] sm:$0xf0]  ;;  %v2282_v58 = vld [vmem:[#allocation8 + $0xa0] sm:$0xf]  ;;  %v2219_v24 = vor.u32 %v2630_v55, %v2218_v23  ;;  %v2646_v25 = vld [vmem:[#allocation8 + $0xa4] sm:$0xf0] }
 0x13a   : > { %1455 = vmatpush.bf16.msra.mxu3 %v2435_v52  ;;  %1414 = vmatpush.bf16.msra.mxu0 %v2235_v59  ;;  %v2419_v22 = vor.u32 %v2680_v21, %v2418_v20  ;;  %v2346_v26 = vld [vmem:[#allocation8 + $0x120] sm:$0xf]  ;;  %v2662_v28 = vld [vmem:[#allocation8 + $0x124] sm:$0xf0]  ;;  %v2283_v29 = vor.u32 %v2646_v25, %v2282_v58  ;;  %v2210_v34 = vld [vmem:[#allocation8 + $0x10] sm:$0xf] }
 0x13b   : > { %v2347_v30 = vor.u32 %v2662_v28, %v2346_v26  ;;  %v2410_v31 = vld [vmem:[#allocation8 + $0x1a0] sm:$0xf]  ;;  %v2678_v32 = vld [vmem:[#allocation8 + $0x1a4] sm:$0xf0]  ;;  %v2628_v35 = vld [vmem:[#allocation8 + $0x14] sm:$0xf0] }
 0x13c   : > { %1428 = vmatpush.bf16.msra.mxu1 %v2299_v3  ;;  %1442 = vmatpush.bf16.msra.mxu2 %v2363_v7  ;;  %v2411_v33 = vor.u32 %v2678_v32, %v2410_v31  ;;  %v2274_v36 = vld [vmem:[#allocation8 + $0x90] sm:$0xf]  ;;  %v2211_v37 = vor.u32 %v2628_v35, %v2210_v34  ;;  %v2644_v38 = vld [vmem:[#allocation8 + $0x94] sm:$0xf0]  ;;  %v2202_v46 = vld [vmem:[#allocation8] sm:$0xf] }
 0x13d   : > { %986 = vadd.xlane.f32.xlu0 %v985_v53  ;;  %v2338_v39 = vld [vmem:[#allocation8 + $0x110] sm:$0xf]  ;;  %v2660_v40 = vld [vmem:[#allocation8 + $0x114] sm:$0xf0]  ;;  %v2275_v41 = vor.u32 %v2644_v38, %v2274_v36  ;;  %v2626_v47 = vld [vmem:[#allocation8 + $0x4] sm:$0xf0] }
 0x13e   : > { %1456 = vmatpush.bf16.msra.mxu3 %v2427_v10  ;;  %1415 = vmatpush.bf16.msra.mxu0 %v2227_v14  ;;  %v2339_v42 = vor.u32 %v2660_v40, %v2338_v39  ;;  %v2402_v43 = vld [vmem:[#allocation8 + $0x190] sm:$0xf]  ;;  %v2676_v44 = vld [vmem:[#allocation8 + $0x194] sm:$0xf0]  ;;  %v2266_v48 = vld [vmem:[#allocation8 + $0x80] sm:$0xf]  ;;  %v2203_v49 = vor.u32 %v2626_v47, %v2202_v46 }
 0x13f   : > { %v2403_v45 = vor.u32 %v2676_v44, %v2402_v43  ;;  %v2642_v50 = vld [vmem:[#allocation8 + $0x84] sm:$0xf0]  ;;  %v2330_v51 = vld [vmem:[#allocation8 + $0x100] sm:$0xf]  ;;  %v2639_v59 = vld [vmem:[#allocation8 + $0x74] sm:$0xf] }
 0x140   : > { %1429 = vmatpush.bf16.msra.mxu1 %v2291_v18  ;;  %1443 = vmatpush.bf16.msra.mxu2 %v2355_v19  ;;  %v2658_v52 = vld [vmem:[#allocation8 + $0x104] sm:$0xf0]  ;;  %v2267_v53 = vor.u32 %v2642_v50, %v2266_v48  ;;  %v2394_v56 = vld [vmem:[#allocation8 + $0x180] sm:$0xf]  ;;  %v2260_v1 = vld [vmem:[#allocation8 + $0x78] sm:$0xf0] }
 0x141   : > { %v2331_v54 = vor.u32 %v2658_v52, %v2330_v51  ;;  %v2674_v57 = vld [vmem:[#allocation8 + $0x184] sm:$0xf0]  ;;  %v2655_v2 = vld [vmem:[#allocation8 + $0xf4] sm:$0xf]  ;;  %v2324_v3 = vld [vmem:[#allocation8 + $0xf8] sm:$0xf0]  ;;  %v2263_v7 = vor.u32 %v2639_v59, %v2260_v1 }
 0x142   : > { %1457 = vmatpush.bf16.msra.mxu3 %v2419_v22  ;;  %1416 = vmatpush.bf16.msra.mxu0 %v2219_v24  ;;  %v2395_v60 = vor.u32 %v2674_v57, %v2394_v56  ;;  %v2327_v8 = vor.u32 %v2655_v2, %v2324_v3  ;;  %v2671_v9 = vld [vmem:[#allocation8 + $0x174] sm:$0xf]  ;;  %v2388_v10 = vld [vmem:[#allocation8 + $0x178] sm:$0xf0]  ;;  %v2637_v14 = vld [vmem:[#allocation8 + $0x64] sm:$0xf] }
 0x143   : > { %v2687_v11 = vld [vmem:[#allocation8 + $0x1f4] sm:$0xf]  ;;  %v2391_v12 = vor.u32 %v2671_v9, %v2388_v10  ;;  %v2452_v13 = vld [vmem:[#allocation8 + $0x1f8] sm:$0xf0]  ;;  %v2252_v15 = vld [vmem:[#allocation8 + $0x68] sm:$0xf0] }
 0x144   : > { %1430 = vmatpush.bf16.msra.mxu1 %v2283_v29  ;;  %1444 = vmatpush.bf16.msra.mxu2 %v2347_v30  ;;  %v2455_v16 = vor.u32 %v2687_v11, %v2452_v13  ;;  %v2255_v17 = vor.u32 %v2637_v14, %v2252_v15  ;;  %v2653_v18 = vld [vmem:[#allocation8 + $0xe4] sm:$0xf]  ;;  %v2316_v19 = vld [vmem:[#allocation8 + $0xe8] sm:$0xf0]  ;;  %v2635_v25 = vld [vmem:[#allocation8 + $0x54] sm:$0xf] }
 0x145   : > { %v2669_v20 = vld [vmem:[#allocation8 + $0x164] sm:$0xf]  ;;  %v2319_v21 = vor.u32 %v2653_v18, %v2316_v19  ;;  %v2380_v22 = vld [vmem:[#allocation8 + $0x168] sm:$0xf0]  ;;  %v2244_v26 = vld [vmem:[#allocation8 + $0x58] sm:$0xf0] }
 0x146   : > { %1458 = vmatpush.bf16.msra.mxu3 %v2411_v33  ;;  %1417 = vmatpush.bf16.msra.mxu0 %v2211_v37  ;;  %v2685_v23 = vld [vmem:[#allocation8 + $0x1e4] sm:$0xf]  ;;  %v2444_v55 = vld [vmem:[#allocation8 + $0x1e8] sm:$0xf0]  ;;  %v2383_v58 = vor.u32 %v2669_v20, %v2380_v22  ;;  %v2651_v28 = vld [vmem:[#allocation8 + $0xd4] sm:$0xf]  ;;  %v2247_v29 = vor.u32 %v2635_v25, %v2244_v26 }
 0x147   : > { %v2447_v24 = vor.u32 %v2685_v23, %v2444_v55  ;;  %v2308_v30 = vld [vmem:[#allocation8 + $0xd8] sm:$0xf0]  ;;  %v2667_v31 = vld [vmem:[#allocation8 + $0x154] sm:$0xf]  ;;  %v2633_v38 = vld [vmem:[#allocation8 + $0x44] sm:$0xf] }
 0x148   : > { %1431 = vmatpush.bf16.msra.mxu1 %v2275_v41  ;;  %1445 = vmatpush.bf16.msra.mxu2 %v2339_v42  ;;  %v2372_v32 = vld [vmem:[#allocation8 + $0x158] sm:$0xf0]  ;;  %v2311_v33 = vor.u32 %v2651_v28, %v2308_v30  ;;  %v2683_v35 = vld [vmem:[#allocation8 + $0x1d4] sm:$0xf]  ;;  %v2236_v39 = vld [vmem:[#allocation8 + $0x48] sm:$0xf0] }
 0x149   : > { %v2375_v34 = vor.u32 %v2667_v31, %v2372_v32  ;;  %v2436_v36 = vld [vmem:[#allocation8 + $0x1d8] sm:$0xf0]  ;;  %v2649_v40 = vld [vmem:[#allocation8 + $0xc4] sm:$0xf]  ;;  %v2300_v41 = vld [vmem:[#allocation8 + $0xc8] sm:$0xf0]  ;;  %v2239_v44 = vor.u32 %v2633_v38, %v2236_v39 }
 0x14a   : > { %1459 = vmatpush.bf16.msra.mxu3 %v2403_v45  ;;  %1418 = vmatpush.bf16.msra.mxu0 %v2203_v49  ;;  %v2439_v37 = vor.u32 %v2683_v35, %v2436_v36  ;;  %v2665_v42 = vld [vmem:[#allocation8 + $0x144] sm:$0xf]  ;;  %v2364_v43 = vld [vmem:[#allocation8 + $0x148] sm:$0xf0]  ;;  %v2303_v45 = vor.u32 %v2649_v40, %v2300_v41  ;;  %v2631_v51 = vld [vmem:[#allocation8 + $0x34] sm:$0xf] }
 0x14b   : > { %v2681_v46 = vld [vmem:[#allocation8 + $0x1c4] sm:$0xf]  ;;  %v2428_v47 = vld [vmem:[#allocation8 + $0x1c8] sm:$0xf0]  ;;  %v2367_v48 = vor.u32 %v2665_v42, %v2364_v43  ;;  %v2228_v52 = vld [vmem:[#allocation8 + $0x38] sm:$0xf0] }
 0x14c   : > { %1432 = vmatpush.bf16.msra.mxu1 %v2267_v53  ;;  %1446 = vmatpush.bf16.msra.mxu2 %v2331_v54  ;;  %v2431_v49 = vor.u32 %v2681_v46, %v2428_v47  ;;  %v2647_v53 = vld [vmem:[#allocation8 + $0xb4] sm:$0xf]  ;;  %v2231_v56 = vor.u32 %v2631_v51, %v2228_v52  ;;  %v2292_v57 = vld [vmem:[#allocation8 + $0xb8] sm:$0xf0]  ;;  %v2629_v9 = vld [vmem:[#allocation8 + $0x24] sm:$0xf] }
 0x14d   : > { %v2663_v59 = vld [vmem:[#allocation8 + $0x134] sm:$0xf]  ;;  %v2356_v1 = vld [vmem:[#allocation8 + $0x138] sm:$0xf0]  ;;  %v2220_v10 = vld [vmem:[#allocation8 + $0x28] sm:$0xf0] }
 0x14e   : > { %1460 = vmatpush.bf16.msra.mxu3 %v2395_v60  ;;  %1467 = vmatpush.bf16.msrb.mxu0 %v2263_v7  ;;  %v2295_v60 = vor.u32 %v2647_v53, %v2292_v57  ;;  %v2679_v2 = vld [vmem:[#allocation8 + $0x1b4] sm:$0xf]  ;;  %v2420_v3 = vld [vmem:[#allocation8 + $0x1b8] sm:$0xf0]  ;;  %v2359_v7 = vor.u32 %v2663_v59, %v2356_v1  ;;  %v2645_v11 = vld [vmem:[#allocation8 + $0xa4] sm:$0xf] }
 0x14f   : > { %v2284_v13 = vld [vmem:[#allocation8 + $0xa8] sm:$0xf0]  ;;  %v2661_v14 = vld [vmem:[#allocation8 + $0x124] sm:$0xf]  ;;  %v2627_v20 = vld [vmem:[#allocation8 + $0x14] sm:$0xf] }
 0x150   : > { %1481 = vmatpush.bf16.msrb.mxu1 %v2327_v8  ;;  %1495 = vmatpush.bf16.msrb.mxu2 %v2391_v12  ;;  %v2423_v8 = vor.u32 %v2679_v2, %v2420_v3  ;;  %v2223_v12 = vor.u32 %v2629_v9, %v2220_v10  ;;  %v2348_v15 = vld [vmem:[#allocation8 + $0x128] sm:$0xf0]  ;;  %v2677_v18 = vld [vmem:[#allocation8 + $0x1a4] sm:$0xf]  ;;  %v2212_v22 = vld [vmem:[#allocation8 + $0x18] sm:$0xf0] }
 0x151   : > { %v2412_v19 = vld [vmem:[#allocation8 + $0x1a8] sm:$0xf0]  ;;  %v2643_v23 = vld [vmem:[#allocation8 + $0x94] sm:$0xf]  ;;  %v2276_v55 = vld [vmem:[#allocation8 + $0x98] sm:$0xf0]  ;;  %v2215_v28 = vor.u32 %v2627_v20, %v2212_v22 }
 0x152   : > { %1509 = vmatpush.bf16.msrb.mxu3 %v2455_v16  ;;  %1468 = vmatpush.bf16.msrb.mxu0 %v2255_v17  ;;  %v2287_v16 = vor.u32 %v2645_v11, %v2284_v13  ;;  %v2351_v17 = vor.u32 %v2661_v14, %v2348_v15  ;;  %v2675_v25 = vld [vmem:[#allocation8 + $0x194] sm:$0xf]  ;;  %v2404_v30 = vld [vmem:[#allocation8 + $0x198] sm:$0xf0]  ;;  %v2625_v31 = vld [vmem:[#allocation8 + $0x4] sm:$0xf] }
 0x153   : > { %v2204_v32 = vld [vmem:[#allocation8 + $0x8] sm:$0xf0]  ;;  %v2641_v36 = vld [vmem:[#allocation8 + $0x84] sm:$0xf]  ;;  %v2407_v39 = vor.u32 %v2675_v25, %v2404_v30  ;;  %v2699_v22 = vld [vmem:[#allocation9 + $0x50] sm:$0xff] }
 0x154   : > { %1482 = vmatpush.bf16.msrb.mxu1 %v2319_v21  ;;  %1496 = vmatpush.bf16.msrb.mxu2 %v2383_v58  ;;  %v2415_v21 = vor.u32 %v2677_v18, %v2412_v19  ;;  %v2659_v58 = vld [vmem:[#allocation8 + $0x114] sm:$0xf]  ;;  %v2657_v40 = vld [vmem:[#allocation8 + $0x104] sm:$0xf]  ;;  %v2332_v41 = vld [vmem:[#allocation8 + $0x108] sm:$0xf0] }
 0x155   : > { %v2673_v42 = vld [vmem:[#allocation8 + $0x184] sm:$0xf]  ;;  %v2396_v43 = vld [vmem:[#allocation8 + $0x188] sm:$0xf0]  ;;  %v2335_v47 = vor.u32 %v2657_v40, %v2332_v41 }
 0x156   : > { %1510 = vmatpush.bf16.msrb.mxu3 %v2447_v24  ;;  %1469 = vmatpush.bf16.msrb.mxu0 %v2247_v29  ;;  %v2340_v24 = vld [vmem:[#allocation8 + $0x118] sm:$0xf0]  ;;  %v2279_v29 = vor.u32 %v2643_v23, %v2276_v55  ;;  %v2702_v18 = vld [vmem:[#allocation9 + $0x68] sm:$0xff]  ;;  %v2689_v19 = vld [vmem:[#allocation9] sm:$0xff] }
 0x157   : > { %v2343_v35 = vor.u32 %v2659_v58, %v2340_v24  ;;  %v2701_v20 = vld [vmem:[#allocation9 + $0x60] sm:$0xff]  ;;  %v2698_v55 = vld [vmem:[#allocation9 + $0x48] sm:$0xff] }
 0x158   : > { %1483 = vmatpush.bf16.msrb.mxu1 %v2311_v33  ;;  %1497 = vmatpush.bf16.msrb.mxu2 %v2375_v34  ;;  %v942_v23 = vld [vmem:[#allocation12 + $0x4] sm:$0x3] }
 0x159   : > { %v1087_v25 = vperm.slane %v942_v23, 0 }
 0x15a   : > { %1511 = vmatpush.bf16.msrb.mxu3 %v2439_v37  ;;  %1470 = vmatpush.bf16.msrb.mxu0 %v2239_v44  ;;  %v2268_v37 = vld [vmem:[#allocation8 + $0x88] sm:$0xf0] }
 0x15b   : > { %v2271_v46 = vor.u32 %v2641_v36, %v2268_v37 }
 0x15c   : > { %1484 = vmatpush.bf16.msrb.mxu1 %v2303_v45  ;;  %1498 = vmatpush.bf16.msrb.mxu2 %v2367_v48  ;;  %v2207_v45 = vor.u32 %v2625_v31, %v2204_v32 }
 0x15e   : > { %1512 = vmatpush.bf16.msrb.mxu3 %v2431_v49  ;;  %1471 = vmatpush.bf16.msrb.mxu0 %v2231_v56  ;;  %v2399_v49 = vor.u32 %v2673_v42, %v2396_v43  ;;  %v1088_v43 = vperm.slane %v942_v23, 1 }
 0x160   : > { %1485 = vmatpush.bf16.msrb.mxu1 %v2295_v60  ;;  %1499 = vmatpush.bf16.msrb.mxu2 %v2359_v7 }
 0x162   : > { %1513 = vmatpush.bf16.msrb.mxu3 %v2423_v8  ;;  %1472 = vmatpush.bf16.msrb.mxu0 %v2223_v12 }
 0x164   : > { %1486 = vmatpush.bf16.msrb.mxu1 %v2287_v16  ;;  %1500 = vmatpush.bf16.msrb.mxu2 %v2351_v17  ;;  %v2690_v17 = vld [vmem:[#allocation9 + $0x8] sm:$0xff] }
 0x166   : > { %1514 = vmatpush.bf16.msrb.mxu3 %v2415_v21  ;;  %1473 = vmatpush.bf16.msrb.mxu0 %v2215_v28  ;;  %v2700_v21 = vld [vmem:[#allocation9 + $0x58] sm:$0xff] }
 0x168   : > { %1487 = vmatpush.bf16.msrb.mxu1 %v2279_v29  ;;  %1501 = vmatpush.bf16.msrb.mxu2 %v2343_v35 }
 0x16a   : > { %1515 = vmatpush.bf16.msrb.mxu3 %v2407_v39  ;;  %1474 = vmatpush.bf16.msrb.mxu0 %v2207_v45 }
 0x16c   : > { %1488 = vmatpush.bf16.msrb.mxu1 %v2271_v46  ;;  %1502 = vmatpush.bf16.msrb.mxu2 %v2335_v47 }
 0x16e   : > { %1516 = vmatpush.bf16.msrb.mxu3 %v2399_v49 }
 0x1a8   : > { %v982_v50 = vpop.xlane.xlu0 %981 }
 0x1a9   : > { %v3490_v54 = vadd.f32 1e-10, %v982_v50 }
 0x1ab   : > { %2833 = vrsqrt.f32 %v3490_v54  ;;  %vm996_vm1 = vweird.f32 %v3490_v54 }
 0x1b0   : > { %v987_v26 = vpop.xlane.xlu0 %986 }
 0x1b1   : > { %v2834_v33 = vpop.eup %2833  ;;  %v989_v34 = vadd.f32 1e-10, %v987_v26  ;;  %v2697_v26 = vld [vmem:[#allocation9 + $0x40] sm:$0xff] }
 0x1b2   : > { %v991_v38 = vmul.f32 %v2834_v33, %v3490_v54  ;;  %vm997_vm0 = vweird.f32 %v2834_v33 }
 0x1b3   : > { %2835 = vrsqrt.f32 %v989_v34  ;;  %vm998_vm2 = vmor %vm996_vm1, %vm997_vm0  ;;  %vm1006_vm4 = vweird.f32 %v989_v34 }
 0x1b4   : > { %v992_v44 = vmul.f32 %v2834_v33, %v991_v38 }
 0x1b6   : > { %v993_v48 = vmul.f32 0.5, %v992_v44 }
 0x1b8   : > { %v994_v50 = vsub.f32 1.5, %v993_v48 }
 0x1b9   : > { %v2836_v51 = vpop.eup %2835 }
 0x1ba   : > { %v1001_v52 = vmul.f32 %v2836_v51, %v989_v34  ;;  %v995_v53 = vmul.f32 %v2834_v33, %v994_v50  ;;  %vm1007_vm3 = vweird.f32 %v2836_v51 }
 0x1bb   : > { %vm1008_vm5 = vmor %vm1006_vm4, %vm1007_vm3 }
 0x1bc   : > { %v1002_v56 = vmul.f32 %v2836_v51, %v1001_v52  ;;  %v999_v60 = vsel %vm998_vm2, %v2834_v33, %v995_v53 }
 0x1bd   : > { %v1010_v2 = vmul.f32 %v999_v60, %v3458_v61  ;;  %v1011_v7 = vmul.f32 %v999_v60, %v3460_v62  ;;  %v1012_v8 = vmul.f32 %v999_v60, %v3462_v63  ;;  %v1013_v9 = vmul.f32 %v999_v60, %v3464_v0  ;;  %v2696_v61 = vld [vmem:[#allocation9 + $0x38] sm:$0xff]  ;;  %v2695_v62 = vld [vmem:[#allocation9 + $0x30] sm:$0xff]  ;;  %v2694_v63 = vld [vmem:[#allocation9 + $0x28] sm:$0xff] }
 0x1be   : > { %v1003_v57 = vmul.f32 0.5, %v1002_v56  ;;  %v2693_v0 = vld [vmem:[#allocation9 + $0x20] sm:$0xff] }
 0x1c0   : > { %v1004_v59 = vsub.f32 1.5, %v1003_v57 }
 0x1c2   : > { %v1005_v1 = vmul.f32 %v2836_v51, %v1004_v59 }
 0x1c4   : > { %v1009_v3 = vsel %vm1008_vm5, %v2836_v51, %v1005_v1 }
 0x1c5   : > { %v1014_v10 = vmul.f32 %v1009_v3, %v3466_v4  ;;  %v1015_v54 = vmul.f32 %v1009_v3, %v3468_v5  ;;  %v1016_v11 = vmul.f32 %v1009_v3, %v3470_v6  ;;  %v1017_v12 = vmul.f32 %v1009_v3, %v3484_v27  ;;  %v2692_v4 = vld [vmem:[#allocation9 + $0x18] sm:$0xff]  ;;  %v2691_v6 = vld [vmem:[#allocation9 + $0x10] sm:$0xff] }
 0x1c6   : > { %v2704_v5 = vld [vmem:[#allocation9 + $0x78] sm:$0xff]  ;;  %v2703_v27 = vld [vmem:[#allocation9 + $0x70] sm:$0xff] }
 0x1c7   : > { %v1018_v13 = vpack.c.bf16 %v1014_v10, %v1010_v2  ;;  %v1019_v14 = vpack.c.bf16 %v1015_v54, %v1011_v7  ;;  %v1020_v15 = vpack.c.bf16 %v1016_v11, %v1012_v8  ;;  %v1021_v16 = vpack.c.bf16 %v1017_v12, %v1013_v9  ;;  %v2712_v54 = vld [vmem:[#allocation11 + $0x38] sm:$0xff]  ;;  %v2711_v11 = vld [vmem:[#allocation11 + $0x30] sm:$0xff]  ;;  %v2710_v12 = vld [vmem:[#allocation11 + $0x28] sm:$0xff] }
 0x1c9   : > { %1419 = vmatmul.bf16.vlgmr.msra.gmra.mxu0 %v1018_v13  ;;  %1433 = vmatmul.bf16.vlgmr.msra.gmra.mxu1 %v1019_v14 }
 0x1ca   : > { %1447 = vmatmul.bf16.vlgmr.msra.gmra.mxu2 %v1020_v15  ;;  %1461 = vmatmul.bf16.vlgmr.msra.gmra.mxu3 %v1021_v16 }
 0x1cb   : > { %1660 = vmatpush.bf16.msra.mxu0 %v2696_v61  ;;  %1674 = vmatpush.bf16.msra.mxu1 %v2704_v5  ;;  %v2705_v61 = vld [vmem:[#allocation11] sm:$0xff] }
 0x1cc   : > { %1758 = vmatpush.bf16.msra.mxu2 %v2712_v54 }
 0x1cf   : > { %1661 = vmatpush.bf16.msra.mxu0 %v2695_v62  ;;  %1675 = vmatpush.bf16.msra.mxu1 %v2703_v27 }
 0x1d0   : > { %1759 = vmatpush.bf16.msra.mxu2 %v2711_v11 }
 0x1d3   : > { %1662 = vmatpush.bf16.msra.mxu0 %v2694_v63  ;;  %1676 = vmatpush.bf16.msra.mxu1 %v2702_v18 }
 0x1d4   : > { %1760 = vmatpush.bf16.msra.mxu2 %v2710_v12 }
 0x1d7   : > { %1663 = vmatpush.bf16.msra.mxu0 %v2693_v0  ;;  %1677 = vmatpush.bf16.msra.mxu1 %v2701_v20  ;;  %v2831_v0 = vld [vmem:[#allocation12 + $0x6] ss:$0 sm:$0xff] }
 0x1d9   : > { %1475 = vmatmul.bf16.vlgmr.msrb.gmra.mxu0 %v1018_v13  ;;  %1489 = vmatmul.bf16.vlgmr.msrb.gmra.mxu1 %v1019_v14  ;;  %v2709_v13 = vld [vmem:[#allocation11 + $0x20] sm:$0xff]  ;;  %v2708_v14 = vld [vmem:[#allocation11 + $0x18] sm:$0xff] }
 0x1da   : > { %1503 = vmatmul.bf16.vlgmr.msrb.gmra.mxu2 %v1020_v15  ;;  %1517 = vmatmul.bf16.vlgmr.msrb.gmra.mxu3 %v1021_v16  ;;  %v2707_v15 = vld [vmem:[#allocation11 + $0x10] sm:$0xff]  ;;  %v2706_v16 = vld [vmem:[#allocation11 + $0x8] sm:$0xff] }
 0x1db   : > { %1664 = vmatpush.bf16.msra.mxu0 %v2692_v4  ;;  %1678 = vmatpush.bf16.msra.mxu1 %v2700_v21 }
 0x1dc   : > { %1761 = vmatpush.bf16.msra.mxu2 %v2709_v13 }
 0x1df   : > { %1665 = vmatpush.bf16.msra.mxu0 %v2691_v6  ;;  %1679 = vmatpush.bf16.msra.mxu1 %v2699_v22  ;;  %v2832_v22 = vld [vmem:[#allocation12 + $0x7] ss:$0 sm:$0xff] }
 0x1e0   : > { %1762 = vmatpush.bf16.msra.mxu2 %v2708_v14 }
 0x1e3   : > { %1666 = vmatpush.bf16.msra.mxu0 %v2690_v17  ;;  %1680 = vmatpush.bf16.msra.mxu1 %v2698_v55 }
 0x1e4   : > { %1763 = vmatpush.bf16.msra.mxu2 %v2707_v15 }
 0x1e7   : > { %1667 = vmatpush.bf16.msra.mxu0 %v2689_v19  ;;  %1681 = vmatpush.bf16.msra.mxu1 %v2697_v26 }
 0x1e8   : > { %1764 = vmatpush.bf16.msra.mxu2 %v2706_v16 }
 0x1ec   : > { %1765 = vmatpush.bf16.msra.mxu2 %v2705_v61 }
 0x246   : > { %v1420_v58 = vpop.f32.mrf.mxu0  ;;  %v1434_v24 = vpop.f32.mrf.mxu1 }
 0x247   : > { %v1421_v28 = vadd.f32 %v1420_v58, %v1087_v25 }
 0x249   : > { %v1435_v33 = vadd.f32 %v1434_v24, %v1421_v28 }
 0x24d   : > { %v1448_v29 = vpop.f32.mrf.mxu2  ;;  %v1462_v30 = vpop.f32.mrf.mxu3 }
 0x24e   : > { %v1422_v31 = vpop.f32.mrf.mxu0  ;;  %v1436_v32 = vpop.f32.mrf.mxu1  ;;  %v1449_v35 = vadd.f32 %v1448_v29, %v1435_v33 }
 0x24f   : > { %v1423_v34 = vadd.f32 %v1422_v31, %v1087_v25 }
 0x250   : > { %v1463_v39 = vadd.f32 %v1462_v30, %v1449_v35 }
 0x251   : > { %v1437_v36 = vadd.f32 %v1436_v32, %v1423_v34 }
 0x252   : > { %v1523_v45 = vmax.f32 %v1463_v39, 0.0 }
 0x255   : > { %v1450_v37 = vpop.f32.mrf.mxu2  ;;  %v1464_v38 = vpop.f32.mrf.mxu3 }
 0x256   : > { %v1451_v40 = vadd.f32 %v1450_v37, %v1437_v36  ;;  %v1476_v41 = vpop.f32.mrf.mxu0  ;;  %v1490_v44 = vpop.f32.mrf.mxu1 }
 0x257   : > { %v1477_v48 = vadd.f32 %v1476_v41, %v1088_v43 }
 0x258   : > { %v1465_v42 = vadd.f32 %v1464_v38, %v1451_v40 }
 0x259   : > { %v1491_v52 = vadd.f32 %v1490_v44, %v1477_v48 }
 0x25a   : > { %v1525_v46 = vmax.f32 %v1465_v42, 0.0 }
 0x25c   : > { %v1527_v47 = vpack.c.bf16 %v1525_v46, %v1523_v45 }
 0x25d   : > { %v1504_v49 = vpop.f32.mrf.mxu2  ;;  %v1518_v50 = vpop.f32.mrf.mxu3 }
 0x25e   : > { %1668 = vmatmul.bf16.vlgmr.msra.gmra.mxu0 %v1527_v47  ;;  %v1478_v51 = vpop.f32.mrf.mxu0  ;;  %v1505_v56 = vadd.f32 %v1504_v49, %v1491_v52  ;;  %v1492_v57 = vpop.f32.mrf.mxu1 }
 0x25f   : > { %v1479_v53 = vadd.f32 %v1478_v51, %v1088_v43 }
 0x260   : > { %v1519_v1 = vadd.f32 %v1518_v50, %v1505_v56 }
 0x261   : > { %v1493_v59 = vadd.f32 %v1492_v57, %v1479_v53 }
 0x262   : > { %v1524_v8 = vmax.f32 %v1519_v1, 0.0 }
 0x265   : > { %v1506_v60 = vpop.f32.mrf.mxu2  ;;  %v1520_v3 = vpop.f32.mrf.mxu3 }
 0x266   : > { %v1507_v2 = vadd.f32 %v1506_v60, %v1493_v59 }
 0x268   : > { %v1521_v7 = vadd.f32 %v1520_v3, %v1507_v2 }
 0x26a   : > { %v1526_v9 = vmax.f32 %v1521_v7, 0.0 }
 0x26c   : > { %v1528_v10 = vpack.c.bf16 %v1526_v9, %v1524_v8 }
 0x26e   : > { %1682 = vmatmul.bf16.vlgmr.msra.gmra.mxu1 %v1528_v10 }
 0x2db   : > { %v1669_v62 = vpop.f32.mrf.mxu0 }
 0x2dc   : > { %v1670_v5 = vadd.f32 %v2831_v0, %v1669_v62 }
 0x2e3   : > { %v1671_v4 = vpop.f32.mrf.mxu0 }
 0x2e4   : > { %v1672_v6 = vadd.f32 %v2831_v0, %v1671_v4 }
 0x2eb   : > { %v1683_v63 = vpop.f32.mrf.mxu1 }
 0x2ec   : > { %v1684_v27 = vadd.f32 %v1683_v63, %v1670_v5 }
 0x2ee   : > { %v1688_v19 = vmax.f32 %v1684_v27, 0.0 }
 0x2f3   : > { %v1685_v17 = vpop.f32.mrf.mxu1 }
 0x2f4   : > { %v1686_v18 = vadd.f32 %v1685_v17, %v1672_v6 }
 0x2f6   : > { %v1689_v20 = vmax.f32 %v1686_v18, 0.0 }
 0x2f8   : > { %v1690_v21 = vpack.c.bf16 %v1689_v20, %v1688_v19 }
 0x2fa   : > { %1766 = vmatmul.bf16.vlgmr.msra.gmra.mxu2 %v1690_v21 }
 0x37d   : > { %v1767_v23 = vpop.f32.mrf.mxu2 }
 0x37e   : > { %v1768_v55 = vadd.f32 %v2832_v22, %v1767_v23 }
 0x380   : > { %1772 = vst [vmem:[#allocation14] sm:$0xff] %v1768_v55 }
 0x385   : > { %v1769_v58 = vpop.f32.mrf.mxu2 }
 0x386   : > { %v1770_v24 = vadd.f32 %v2832_v22, %v1769_v58 }
 0x388   : > { %1773 = vst [vmem:[#allocation14 + $0x8] sm:$0xff] %v1770_v24 }
 0x389 PF: > { %p2766_p3 = scmp.eq.s32.totalorder %s3196_s27, 2  ;;  %s1784_s28 = sshll.u32 %s3531_s6, 4  ;;  %s1785_s28 = int_to_ptr.hbm [resolvable:$true] %s1784_s28 }
 0x38a   : > { %s3129_s8 = smov [#allocation14]   ;;  %s3130_s17 = smov 128  }
 0x38b   : > { %s1782_s18 = sshll.u32 %s3129_s8, 4  ;;  %s3131_s29 = smov 8   ;;  %s1783_s18 = int_to_ptr.vmem [resolvable:$true] %s1782_s18 }
 0x38c   : > { %2734 = dma.vmem_to_hbm [thread:$0]  (%p2766_p3), %s1783_s18, 256, %s1785_s28, [#allocation5], %s3130_s17, %s3130_s17, %s3131_s29  }
 0x38d   : > { %3090 = dma.done.wait (%p2766_p3), [#allocation5], 256  }
 0x38e   : > { %3092 = vsyncadd (%p2766_p3), [#allocation5], 4294967040 }
 0x38f PF: > { %s25_s26 = sadd.s32 1, %s3115_s26   ;;  %s3553_s27 = sld [smem:[#allocation21_spill]] }
 0x390   : > { %p22_p4 = scmp.ge.s32.totalorder %s25_s26, 5   ;;  %s3554_s21 = smov %s3099_s22 }
 0x391   : > { %s3555_s22 = smov %s3103_s23  ;;  %s3556_s23 = smov %s3260_s7 }
 0x392   : > { %s3557_s24 = smov %s3111_s25  ;;  %24 = sbr.rel (!%p22_p4) target bundleno = 15 (0xf), region = 119 }
 0x395   : > { %s3558_s25 = smov %s3553_s27 }
 0x397   :  { %1801 = vsyncpa [#allocation4], 1 }
 0x398   :  { %1803 = vsyncpa [#allocation4 + $0x1], 1 }
 0x399   :  { %1804 = vsyncpa [#allocation7], 1 }
 0x39a   :  { %1806 = vsyncpa [#allocation7 + $0x1], 1 }
 0x39b   :  { %1807 = vsyncpa [#allocation10], 1 }
 0x39c   :  { %1808 = vsyncpa [#allocation13], 1 }
 0x39d   :  { %1809 = vsyncpa [#allocation5], 1 }
 0x39e   :  { %1811 = vsyncpa [#allocation5 + $0x1], 1 }

</bundles_post_ra>
